<compile_context>
chip_gen: v5e
topology: v5e:2x2
jax: 0.10.0
libtpu: 0.0.40
codegen_flags: <defaults>
</compile_context>

<pallas_src>
import jax
import jax.numpy as jnp
from jax.experimental import pallas as pl
from jax.experimental.pallas import tpu as pltpu

# ------------------------ small synthetic config ------------------------
VOCAB = 128
HIDDEN = 64
N_LAYERS = 2
N_HEADS = 4
HEAD_DIM = HIDDEN // N_HEADS
INTERMEDIATE = 128
SEQ = 16
BATCH = 2
LN_EPS = 1e-5


# ------------------------------ kernel -----------------------------------

def _ln(x, g, b):
    """LayerNorm over the last axis, f32 math."""
    mu = jnp.mean(x, axis=-1, keepdims=True)
    var = jnp.mean(jnp.square(x - mu), axis=-1, keepdims=True)
    return (x - mu) * jax.lax.rsqrt(var + LN_EPS) * g + b


def _mm(a, b):
    """bf16-operand matmul on the MXU with f32 accumulation."""
    return jnp.dot(a.astype(jnp.bfloat16), b.astype(jnp.bfloat16),
                   preferred_element_type=jnp.float32)


def _encoder_kernel(emb_ref, bias_ref, gmask_ref,
                    elng_ref, elnb_ref,
                    wqkv_ref, bqkv_ref, wo_ref, bo_ref,
                    ln1g_ref, ln1b_ref,
                    w1_ref, b1_ref, w2_ref, b2_ref,
                    ln2g_ref, ln2b_ref,
                    hlng_ref, hlnb_ref, clfw_ref, clfb_ref,
                    out_ref, x_scr):
    """One grid step = (one batch row, one transformer layer), fully fused."""
    l = pl.program_id(1)

    # ---- layer 0: initialise the residual stream with embedding LayerNorm ----
    @pl.when(l == 0)
    def _():
        x_scr[...] = _ln(emb_ref[0], elng_ref[...], elnb_ref[...])

    x = x_scr[...]                                     # (S, H) f32

    # ---- fused QKV projection: one (H, 3H) matmul instead of three ----
    qkv = _mm(x, wqkv_ref[0]) + bqkv_ref[0]            # (S, 3H)
    q = qkv[:, :HIDDEN]
    k = qkv[:, HIDDEN:2 * HIDDEN]
    v = qkv[:, 2 * HIDDEN:]

    # ---- multi-head attention (window >= SEQ => identical to Longformer local) ----
    bias = bias_ref[0]                                 # (1, S) additive key mask
    scale = 1.0 / (HEAD_DIM ** 0.5)
    ctx_heads = []
    for h in range(N_HEADS):                           # static unroll, no grid steps
        sl = slice(h * HEAD_DIM, (h + 1) * HEAD_DIM)
        s = _mm(q[:, sl], k[:, sl].T) * scale + bias   # (S, S)
        m = jnp.max(s, axis=-1, keepdims=True)
        p = jnp.exp(s - m)
        p = p * pl.reciprocal(jnp.sum(p, axis=-1, keepdims=True), approx=True)
        ctx_heads.append(_mm(p, v[:, sl]))             # (S, dH)
    ctx = jnp.concatenate(ctx_heads, axis=-1)          # (S, H)

    # ---- output projection + residual + LayerNorm (fused epilogue) ----
    attn_out = _mm(ctx, wo_ref[0]) + bo_ref[0]
    x = _ln(x + attn_out, ln1g_ref[0], ln1b_ref[0])

    # ---- FFN + residual + LayerNorm (fused epilogue) ----
    # TODO(synk): PyTorch/HF Longformer use erf-GELU; tanh approximation used here.
    h1 = jax.nn.gelu(_mm(x, w1_ref[0]) + b1_ref[0], approximate=True)
    ffn_out = _mm(h1, w2_ref[0]) + b2_ref[0]
    x = _ln(x + ffn_out, ln2g_ref[0], ln2b_ref[0])

    x_scr[...] = x

    # ---- cross-encoder head on the last layer step only ----
    @pl.when(l == pl.num_programs(1) - 1)
    def _():
        g = gmask_ref[0]                                           # (S, 1) float mask
        cls = x[0:1, :]                                            # (1, H)
        summed = jnp.sum(x * g, axis=0, keepdims=True)             # (1, H)
        cnt = jnp.maximum(jnp.sum(g, axis=0, keepdims=True), 1.0)  # clamp(min=1)
        mean = summed / cnt                                        # (1, H)
        comb = jnp.concatenate([cls, mean], axis=-1)               # (1, 2H)
        # dropout(p=0.2) is identity in eval mode
        normed = _ln(comb, hlng_ref[...], hlnb_ref[...])
        # Linear(2H, 1) as a VPU lane reduction (avoids a degenerate N=1 MXU op)
        logit = jnp.sum(normed * clfw_ref[...], axis=-1, keepdims=True) + clfb_ref[...]
        out_ref[0] = logit


# --------------------------- parameter init -----------------------------

def init_params(key):
    keys = jax.random.split(key, 8)
    std = 0.02
    L, H, I = N_LAYERS, HIDDEN, INTERMEDIATE

    def w(k, shape, scale=std):
        return scale * jax.random.normal(k, shape, jnp.float32)

    return {
        "word_emb": w(keys[0], (VOCAB, H)),
        "pos_emb": w(keys[1], (SEQ, H)),
        "emb_ln_g": jnp.ones((1, H), jnp.float32),
        "emb_ln_b": jnp.zeros((1, H), jnp.float32),
        # per-layer weights stacked on a leading layer axis (streamed by BlockSpec)
        "wqkv": w(keys[2], (L, H, 3 * H)),
        "bqkv": jnp.zeros((L, 1, 3 * H), jnp.float32),
        "wo": w(keys[3], (L, H, H)),
        "bo": jnp.zeros((L, 1, H), jnp.float32),
        "ln1_g": jnp.ones((L, 1, H), jnp.float32),
        "ln1_b": jnp.zeros((L, 1, H), jnp.float32),
        "w1": w(keys[4], (L, H, I)),
        "b1": jnp.zeros((L, 1, I), jnp.float32),
        "w2": w(keys[5], (L, I, H)),
        "b2": jnp.zeros((L, 1, H), jnp.float32),
        "ln2_g": jnp.ones((L, 1, H), jnp.float32),
        "ln2_b": jnp.zeros((L, 1, H), jnp.float32),
        "head_ln_g": jnp.ones((1, 2 * H), jnp.float32),
        "head_ln_b": jnp.zeros((1, 2 * H), jnp.float32),
        # nn.init.kaiming_normal_(nonlinearity='relu'): std = sqrt(2 / fan_in)
        "clf_w": w(keys[6], (1, 2 * H), scale=(2.0 / (2 * H)) ** 0.5),
        "clf_b": jnp.zeros((1, 1), jnp.float32),
    }


# ------------------------------ forward ----------------------------------

def longformer_cross_encoder(params, input_ids, attention_mask,
                             global_attention_mask):
    B, S = input_ids.shape
    # TODO(synk): token-id embedding gather has no clean Pallas tile pattern at
    # this size; done in plain JAX glue.
    emb = params["word_emb"][input_ids] + params["pos_emb"][jnp.arange(S)][None]

    # additive key-padding bias (attention_mask == 0 -> -1e9), float global mask
    bias = ((1.0 - attention_mask.astype(jnp.float32)) * -1e9).reshape(B, 1, S)
    gmask = global_attention_mask.astype(jnp.float32).reshape(B, S, 1)

    row3 = lambda b, l: (b, 0, 0)      # per-batch, layer-invariant 3-D inputs
    lay3 = lambda b, l: (l, 0, 0)      # stacked per-layer weights
    const2 = lambda b, l: (0, 0)       # shared 2-D params

    in_specs = [
        pl.BlockSpec((1, S, HIDDEN), row3),             # emb
        pl.BlockSpec((1, 1, S), row3),                  # bias
        pl.BlockSpec((1, S, 1), row3),                  # gmask
        pl.BlockSpec((1, HIDDEN), const2),              # emb_ln_g
        pl.BlockSpec((1, HIDDEN), const2),              # emb_ln_b
        pl.BlockSpec((1, HIDDEN, 3 * HIDDEN), lay3),    # wqkv
        pl.BlockSpec((1, 1, 3 * HIDDEN), lay3),         # bqkv
        pl.BlockSpec((1, HIDDEN, HIDDEN), lay3),        # wo
        pl.BlockSpec((1, 1, HIDDEN), lay3),             # bo
        pl.BlockSpec((1, 1, HIDDEN), lay3),             # ln1_g
        pl.BlockSpec((1, 1, HIDDEN), lay3),             # ln1_b
        pl.BlockSpec((1, HIDDEN, INTERMEDIATE), lay3),  # w1
        pl.BlockSpec((1, 1, INTERMEDIATE), lay3),       # b1
        pl.BlockSpec((1, INTERMEDIATE, HIDDEN), lay3),  # w2
        pl.BlockSpec((1, 1, HIDDEN), lay3),             # b2
        pl.BlockSpec((1, 1, HIDDEN), lay3),             # ln2_g
        pl.BlockSpec((1, 1, HIDDEN), lay3),             # ln2_b
        pl.BlockSpec((1, 2 * HIDDEN), const2),          # head_ln_g
        pl.BlockSpec((1, 2 * HIDDEN), const2),          # head_ln_b
        pl.BlockSpec((1, 2 * HIDDEN), const2),          # clf_w
        pl.BlockSpec((1, 1), const2),                   # clf_b
    ]

    logits = pl.pallas_call(
        _encoder_kernel,
        out_shape=jax.ShapeDtypeStruct((B, 1, 1), jnp.float32),
        grid=(B, N_LAYERS),
        in_specs=in_specs,
        out_specs=pl.BlockSpec((1, 1, 1), row3),
        scratch_shapes=[pltpu.VMEM((S, HIDDEN), jnp.float32)],
        compiler_params=pltpu.CompilerParams(
            dimension_semantics=("parallel", "arbitrary")),
    )(emb, bias, gmask,
      params["emb_ln_g"], params["emb_ln_b"],
      params["wqkv"], params["bqkv"], params["wo"], params["bo"],
      params["ln1_g"], params["ln1_b"],
      params["w1"], params["b1"], params["w2"], params["b2"],
      params["ln2_g"], params["ln2_b"],
      params["head_ln_g"], params["head_ln_b"],
      params["clf_w"], params["clf_b"])
    return logits.reshape(B, 1)


# -------------------------------- main ------------------------------------

if __name__ == "__main__":
    key = jax.random.PRNGKey(0)
    k_params, k_ids = jax.random.split(key)
    params = init_params(k_params)

    input_ids = jax.random.randint(k_ids, (BATCH, SEQ), 0, VOCAB, dtype=jnp.int32)
    attention_mask = jnp.ones((BATCH, SEQ), jnp.int32).at[1, -4:].set(0)
    global_attention_mask = jnp.zeros((BATCH, SEQ), jnp.int32).at[:, 0].set(1)
    global_attention_mask = global_attention_mask.at[:, 1].set(1)

    logits = jax.jit(longformer_cross_encoder)(
        params, input_ids, attention_mask, global_attention_mask)
    jax.block_until_ready(logits)
    assert logits.shape == (BATCH, 1) and logits.dtype == jnp.float32
    print("KERNEL_OK")
</pallas_src>

<mosaic_0001>
module attributes {stable_mosaic.version = 11 : i64} {
  func.func @_encoder_kernel(%arg0: i32, %arg1: i32, %arg2: memref<1x16x64xf32, #tpu.memory_space<vmem>>, %arg3: memref<1x1x16xf32, #tpu.memory_space<vmem>>, %arg4: memref<1x16x1xf32, #tpu.memory_space<vmem>>, %arg5: memref<1x64xf32, #tpu.memory_space<vmem>>, %arg6: memref<1x64xf32, #tpu.memory_space<vmem>>, %arg7: memref<1x64x192xf32, #tpu.memory_space<vmem>>, %arg8: memref<1x1x192xf32, #tpu.memory_space<vmem>>, %arg9: memref<1x64x64xf32, #tpu.memory_space<vmem>>, %arg10: memref<1x1x64xf32, #tpu.memory_space<vmem>>, %arg11: memref<1x1x64xf32, #tpu.memory_space<vmem>>, %arg12: memref<1x1x64xf32, #tpu.memory_space<vmem>>, %arg13: memref<1x64x128xf32, #tpu.memory_space<vmem>>, %arg14: memref<1x1x128xf32, #tpu.memory_space<vmem>>, %arg15: memref<1x128x64xf32, #tpu.memory_space<vmem>>, %arg16: memref<1x1x64xf32, #tpu.memory_space<vmem>>, %arg17: memref<1x1x64xf32, #tpu.memory_space<vmem>>, %arg18: memref<1x1x64xf32, #tpu.memory_space<vmem>>, %arg19: memref<1x128xf32, #tpu.memory_space<vmem>>, %arg20: memref<1x128xf32, #tpu.memory_space<vmem>>, %arg21: memref<1x128xf32, #tpu.memory_space<vmem>>, %arg22: memref<1x1xf32, #tpu.memory_space<vmem>>, %arg23: memref<1x1x1xf32, #tpu.memory_space<vmem>>, %arg24: memref<16x64xf32, #tpu.memory_space<vmem>>) attributes {dimension_semantics = [#tpu.dimension_semantics<parallel>, #tpu.dimension_semantics<arbitrary>], iteration_bounds = array<i64: 2, 2>, scalar_prefetch = 0 : i64, scratch_operands = 1 : i64, tpu.core_type = #tpu.core_type<tc>, window_params = [{transform_indices = @transform_0, window_bounds = array<i64: 1, 16, 64>}, {transform_indices = @transform_1, window_bounds = array<i64: 1, 1, 16>}, {transform_indices = @transform_2, window_bounds = array<i64: 1, 16, 1>}, {pipeline_mode = #tpu.pipeline_mode<synchronous>, transform_indices = @transform_3, window_bounds = array<i64: 1, 64>}, {pipeline_mode = #tpu.pipeline_mode<synchronous>, transform_indices = @transform_4, window_bounds = array<i64: 1, 64>}, {transform_indices = @transform_5, window_bounds = array<i64: 1, 64, 192>}, {transform_indices = @transform_6, window_bounds = array<i64: 1, 1, 192>}, {transform_indices = @transform_7, window_bounds = array<i64: 1, 64, 64>}, {transform_indices = @transform_8, window_bounds = array<i64: 1, 1, 64>}, {transform_indices = @transform_9, window_bounds = array<i64: 1, 1, 64>}, {transform_indices = @transform_10, window_bounds = array<i64: 1, 1, 64>}, {transform_indices = @transform_11, window_bounds = array<i64: 1, 64, 128>}, {transform_indices = @transform_12, window_bounds = array<i64: 1, 1, 128>}, {transform_indices = @transform_13, window_bounds = array<i64: 1, 128, 64>}, {transform_indices = @transform_14, window_bounds = array<i64: 1, 1, 64>}, {transform_indices = @transform_15, window_bounds = array<i64: 1, 1, 64>}, {transform_indices = @transform_16, window_bounds = array<i64: 1, 1, 64>}, {pipeline_mode = #tpu.pipeline_mode<synchronous>, transform_indices = @transform_17, window_bounds = array<i64: 1, 128>}, {pipeline_mode = #tpu.pipeline_mode<synchronous>, transform_indices = @transform_18, window_bounds = array<i64: 1, 128>}, {pipeline_mode = #tpu.pipeline_mode<synchronous>, transform_indices = @transform_19, window_bounds = array<i64: 1, 128>}, {pipeline_mode = #tpu.pipeline_mode<synchronous>, transform_indices = @transform_20, window_bounds = array<i64: 1, 1>}, {transform_indices = @transform_21, window_bounds = array<i64: 1, 1, 1>}]} {
    %c0_i32 = arith.constant 0 : i32
    %0 = arith.cmpi eq, %arg1, %c0_i32 : i32
    %1 = arith.extui %0 : i1 to i32
    %c0_i32_0 = arith.constant 0 : i32
    %2 = arith.cmpi ne, %1, %c0_i32_0 : i32
    scf.if %2 {
      %c0_81 = arith.constant 0 : index
      %c0_82 = arith.constant 0 : index
      %c0_83 = arith.constant 0 : index
      %213 = vector.load %arg2[%c0_81, %c0_82, %c0_83] : memref<1x16x64xf32, #tpu.memory_space<vmem>>, vector<1x16x64xf32>
      %214 = vector.shape_cast %213 : vector<1x16x64xf32> to vector<16x64xf32>
      %c0_84 = arith.constant 0 : index
      %c0_85 = arith.constant 0 : index
      %215 = vector.load %arg5[%c0_84, %c0_85] : memref<1x64xf32, #tpu.memory_space<vmem>>, vector<1x64xf32>
      %c0_86 = arith.constant 0 : index
      %c0_87 = arith.constant 0 : index
      %216 = vector.load %arg6[%c0_86, %c0_87] : memref<1x64xf32, #tpu.memory_space<vmem>>, vector<1x64xf32>
      %cst_88 = arith.constant dense<0.000000e+00> : vector<16xf32>
      %217 = vector.multi_reduction <add>, %214, %cst_88 [1] : vector<16x64xf32> to vector<16xf32>
      %218 = vector.shape_cast %217 : vector<16xf32> to vector<16x1xf32>
      %cst_89 = arith.constant 6.400000e+01 : f32
      %219 = vector.broadcast %cst_89 : f32 to vector<16x1xf32>
      %220 = arith.divf %218, %219 : vector<16x1xf32>
      %221 = vector.broadcast %220 : vector<16x1xf32> to vector<16x64xf32>
      %222 = arith.subf %214, %221 : vector<16x64xf32>
      %223 = arith.mulf %222, %222 : vector<16x64xf32>
      %cst_90 = arith.constant dense<0.000000e+00> : vector<16xf32>
      %224 = vector.multi_reduction <add>, %223, %cst_90 [1] : vector<16x64xf32> to vector<16xf32>
      %225 = vector.shape_cast %224 : vector<16xf32> to vector<16x1xf32>
      %cst_91 = arith.constant 6.400000e+01 : f32
      %226 = vector.broadcast %cst_91 : f32 to vector<16x1xf32>
      %227 = arith.divf %225, %226 : vector<16x1xf32>
      %228 = vector.broadcast %220 : vector<16x1xf32> to vector<16x64xf32>
      %229 = arith.subf %214, %228 : vector<16x64xf32>
      %cst_92 = arith.constant 9.99999974E-6 : f32
      %230 = vector.broadcast %cst_92 : f32 to vector<16x1xf32>
      %231 = arith.addf %227, %230 : vector<16x1xf32>
      %232 = math.rsqrt %231 : vector<16x1xf32>
      %233 = vector.broadcast %232 : vector<16x1xf32> to vector<16x64xf32>
      %234 = arith.mulf %229, %233 : vector<16x64xf32>
      %235 = vector.broadcast %215 : vector<1x64xf32> to vector<16x64xf32>
      %236 = arith.mulf %234, %235 : vector<16x64xf32>
      %237 = vector.broadcast %216 : vector<1x64xf32> to vector<16x64xf32>
      %238 = arith.addf %236, %237 : vector<16x64xf32>
      %c0_93 = arith.constant 0 : index
      %c0_94 = arith.constant 0 : index
      %239 = vector.load %arg24[%c0_93, %c0_94] : memref<16x64xf32, #tpu.memory_space<vmem>>, vector<16x64xf32>
      tpu.vector_store %arg24[%c0_93, %c0_94], %238 {strides = array<i32>} : memref<16x64xf32, #tpu.memory_space<vmem>>, vector<16x64xf32>,
    } else {
    }
    %c0 = arith.constant 0 : index
    %c0_1 = arith.constant 0 : index
    %3 = vector.load %arg24[%c0, %c0_1] : memref<16x64xf32, #tpu.memory_space<vmem>>, vector<16x64xf32>
    %c0_2 = arith.constant 0 : index
    %c0_3 = arith.constant 0 : index
    %c0_4 = arith.constant 0 : index
    %4 = vector.load %arg7[%c0_2, %c0_3, %c0_4] : memref<1x64x192xf32, #tpu.memory_space<vmem>>, vector<1x64x192xf32>
    %5 = vector.shape_cast %4 : vector<1x64x192xf32> to vector<64x192xf32>
    %6 = arith.truncf %3 : vector<16x64xf32> to vector<16x64xbf16>
    %7 = arith.truncf %5 : vector<64x192xf32> to vector<64x192xbf16>
    %cst = arith.constant dense<0.000000e+00> : vector<16x192xf32>
    %8 = tpu.matmul %6, %7, %cst {dimension_numbers = #tpu.dot_dimension_numbers<[1], [0], [0], [1], [0, 0, 1, 1], [], []>} : vector<16x64xbf16>, vector<64x192xbf16>, vector<16x192xf32> -> vector<16x192xf32>
    %c0_5 = arith.constant 0 : index
    %c0_6 = arith.constant 0 : index
    %c0_7 = arith.constant 0 : index
    %9 = vector.load %arg8[%c0_5, %c0_6, %c0_7] : memref<1x1x192xf32, #tpu.memory_space<vmem>>, vector<1x1x192xf32>
    %10 = vector.shape_cast %9 : vector<1x1x192xf32> to vector<1x192xf32>
    %11 = vector.broadcast %10 : vector<1x192xf32> to vector<16x192xf32>
    %12 = arith.addf %8, %11 : vector<16x192xf32>
    %13 = vector.extract_strided_slice %12 {offsets = [0, 0], sizes = [16, 64], strides = [1, 1]} : vector<16x192xf32> to vector<16x64xf32>
    %14 = vector.extract_strided_slice %12 {offsets = [0, 64], sizes = [16, 64], strides = [1, 1]} : vector<16x192xf32> to vector<16x64xf32>
    %15 = vector.extract_strided_slice %12 {offsets = [0, 128], sizes = [16, 64], strides = [1, 1]} : vector<16x192xf32> to vector<16x64xf32>
    %c0_8 = arith.constant 0 : index
    %c0_9 = arith.constant 0 : index
    %c0_10 = arith.constant 0 : index
    %16 = vector.load %arg3[%c0_8, %c0_9, %c0_10] : memref<1x1x16xf32, #tpu.memory_space<vmem>>, vector<1x1x16xf32>
    %17 = vector.shape_cast %16 : vector<1x1x16xf32> to vector<1x16xf32>
    %18 = vector.extract_strided_slice %13 {offsets = [0, 0], sizes = [16, 16], strides = [1, 1]} : vector<16x64xf32> to vector<16x16xf32>
    %19 = vector.extract_strided_slice %14 {offsets = [0, 0], sizes = [16, 16], strides = [1, 1]} : vector<16x64xf32> to vector<16x16xf32>
    %20 = tpu.transpose %19, [1, 0] : vector<16x16xf32> -> vector<16x16xf32>
    %21 = arith.truncf %18 : vector<16x16xf32> to vector<16x16xbf16>
    %22 = arith.truncf %20 : vector<16x16xf32> to vector<16x16xbf16>
    %cst_11 = arith.constant dense<0.000000e+00> : vector<16x16xf32>
    %23 = tpu.matmul %21, %22, %cst_11 {dimension_numbers = #tpu.dot_dimension_numbers<[1], [0], [0], [1], [0, 0, 1, 1], [], []>} : vector<16x16xbf16>, vector<16x16xbf16>, vector<16x16xf32> -> vector<16x16xf32>
    %cst_12 = arith.constant 2.500000e-01 : f32
    %24 = vector.broadcast %cst_12 : f32 to vector<16x16xf32>
    %25 = arith.mulf %23, %24 : vector<16x16xf32>
    %26 = vector.broadcast %17 : vector<1x16xf32> to vector<16x16xf32>
    %27 = arith.addf %25, %26 : vector<16x16xf32>
    %cst_13 = arith.constant dense<0xFF800000> : vector<16xf32>
    %28 = vector.multi_reduction <maximumf>, %27, %cst_13 [1] : vector<16x16xf32> to vector<16xf32>
    %29 = vector.shape_cast %28 : vector<16xf32> to vector<16x1xf32>
    %30 = vector.broadcast %29 : vector<16x1xf32> to vector<16x16xf32>
    %31 = arith.subf %27, %30 : vector<16x16xf32>
    %32 = math.exp %31 : vector<16x16xf32>
    %cst_14 = arith.constant dense<0.000000e+00> : vector<16xf32>
    %33 = vector.multi_reduction <add>, %32, %cst_14 [1] : vector<16x16xf32> to vector<16xf32>
    %34 = vector.shape_cast %33 : vector<16xf32> to vector<16x1xf32>
    %35 = tpu.reciprocal %34 {approx = true} : vector<16x1xf32> -> vector<16x1xf32>
    %36 = vector.broadcast %35 : vector<16x1xf32> to vector<16x16xf32>
    %37 = arith.mulf %32, %36 : vector<16x16xf32>
    %38 = vector.extract_strided_slice %15 {offsets = [0, 0], sizes = [16, 16], strides = [1, 1]} : vector<16x64xf32> to vector<16x16xf32>
    %39 = arith.truncf %37 : vector<16x16xf32> to vector<16x16xbf16>
    %40 = arith.truncf %38 : vector<16x16xf32> to vector<16x16xbf16>
    %cst_15 = arith.constant dense<0.000000e+00> : vector<16x16xf32>
    %41 = tpu.matmul %39, %40, %cst_15 {dimension_numbers = #tpu.dot_dimension_numbers<[1], [0], [0], [1], [0, 0, 1, 1], [], []>} : vector<16x16xbf16>, vector<16x16xbf16>, vector<16x16xf32> -> vector<16x16xf32>
    %42 = vector.extract_strided_slice %13 {offsets = [0, 16], sizes = [16, 16], strides = [1, 1]} : vector<16x64xf32> to vector<16x16xf32>
    %43 = vector.extract_strided_slice %14 {offsets = [0, 16], sizes = [16, 16], strides = [1, 1]} : vector<16x64xf32> to vector<16x16xf32>
    %44 = tpu.transpose %43, [1, 0] : vector<16x16xf32> -> vector<16x16xf32>
    %45 = arith.truncf %42 : vector<16x16xf32> to vector<16x16xbf16>
    %46 = arith.truncf %44 : vector<16x16xf32> to vector<16x16xbf16>
    %cst_16 = arith.constant dense<0.000000e+00> : vector<16x16xf32>
    %47 = tpu.matmul %45, %46, %cst_16 {dimension_numbers = #tpu.dot_dimension_numbers<[1], [0], [0], [1], [0, 0, 1, 1], [], []>} : vector<16x16xbf16>, vector<16x16xbf16>, vector<16x16xf32> -> vector<16x16xf32>
    %cst_17 = arith.constant 2.500000e-01 : f32
    %48 = vector.broadcast %cst_17 : f32 to vector<16x16xf32>
    %49 = arith.mulf %47, %48 : vector<16x16xf32>
    %50 = vector.broadcast %17 : vector<1x16xf32> to vector<16x16xf32>
    %51 = arith.addf %49, %50 : vector<16x16xf32>
    %cst_18 = arith.constant dense<0xFF800000> : vector<16xf32>
    %52 = vector.multi_reduction <maximumf>, %51, %cst_18 [1] : vector<16x16xf32> to vector<16xf32>
    %53 = vector.shape_cast %52 : vector<16xf32> to vector<16x1xf32>
    %54 = vector.broadcast %53 : vector<16x1xf32> to vector<16x16xf32>
    %55 = arith.subf %51, %54 : vector<16x16xf32>
    %56 = math.exp %55 : vector<16x16xf32>
    %cst_19 = arith.constant dense<0.000000e+00> : vector<16xf32>
    %57 = vector.multi_reduction <add>, %56, %cst_19 [1] : vector<16x16xf32> to vector<16xf32>
    %58 = vector.shape_cast %57 : vector<16xf32> to vector<16x1xf32>
    %59 = tpu.reciprocal %58 {approx = true} : vector<16x1xf32> -> vector<16x1xf32>
    %60 = vector.broadcast %59 : vector<16x1xf32> to vector<16x16xf32>
    %61 = arith.mulf %56, %60 : vector<16x16xf32>
    %62 = vector.extract_strided_slice %15 {offsets = [0, 16], sizes = [16, 16], strides = [1, 1]} : vector<16x64xf32> to vector<16x16xf32>
    %63 = arith.truncf %61 : vector<16x16xf32> to vector<16x16xbf16>
    %64 = arith.truncf %62 : vector<16x16xf32> to vector<16x16xbf16>
    %cst_20 = arith.constant dense<0.000000e+00> : vector<16x16xf32>
    %65 = tpu.matmul %63, %64, %cst_20 {dimension_numbers = #tpu.dot_dimension_numbers<[1], [0], [0], [1], [0, 0, 1, 1], [], []>} : vector<16x16xbf16>, vector<16x16xbf16>, vector<16x16xf32> -> vector<16x16xf32>
    %66 = vector.extract_strided_slice %13 {offsets = [0, 32], sizes = [16, 16], strides = [1, 1]} : vector<16x64xf32> to vector<16x16xf32>
    %67 = vector.extract_strided_slice %14 {offsets = [0, 32], sizes = [16, 16], strides = [1, 1]} : vector<16x64xf32> to vector<16x16xf32>
    %68 = tpu.transpose %67, [1, 0] : vector<16x16xf32> -> vector<16x16xf32>
    %69 = arith.truncf %66 : vector<16x16xf32> to vector<16x16xbf16>
    %70 = arith.truncf %68 : vector<16x16xf32> to vector<16x16xbf16>
    %cst_21 = arith.constant dense<0.000000e+00> : vector<16x16xf32>
    %71 = tpu.matmul %69, %70, %cst_21 {dimension_numbers = #tpu.dot_dimension_numbers<[1], [0], [0], [1], [0, 0, 1, 1], [], []>} : vector<16x16xbf16>, vector<16x16xbf16>, vector<16x16xf32> -> vector<16x16xf32>
    %cst_22 = arith.constant 2.500000e-01 : f32
    %72 = vector.broadcast %cst_22 : f32 to vector<16x16xf32>
    %73 = arith.mulf %71, %72 : vector<16x16xf32>
    %74 = vector.broadcast %17 : vector<1x16xf32> to vector<16x16xf32>
    %75 = arith.addf %73, %74 : vector<16x16xf32>
    %cst_23 = arith.constant dense<0xFF800000> : vector<16xf32>
    %76 = vector.multi_reduction <maximumf>, %75, %cst_23 [1] : vector<16x16xf32> to vector<16xf32>
    %77 = vector.shape_cast %76 : vector<16xf32> to vector<16x1xf32>
    %78 = vector.broadcast %77 : vector<16x1xf32> to vector<16x16xf32>
    %79 = arith.subf %75, %78 : vector<16x16xf32>
    %80 = math.exp %79 : vector<16x16xf32>
    %cst_24 = arith.constant dense<0.000000e+00> : vector<16xf32>
    %81 = vector.multi_reduction <add>, %80, %cst_24 [1] : vector<16x16xf32> to vector<16xf32>
    %82 = vector.shape_cast %81 : vector<16xf32> to vector<16x1xf32>
    %83 = tpu.reciprocal %82 {approx = true} : vector<16x1xf32> -> vector<16x1xf32>
    %84 = vector.broadcast %83 : vector<16x1xf32> to vector<16x16xf32>
    %85 = arith.mulf %80, %84 : vector<16x16xf32>
    %86 = vector.extract_strided_slice %15 {offsets = [0, 32], sizes = [16, 16], strides = [1, 1]} : vector<16x64xf32> to vector<16x16xf32>
    %87 = arith.truncf %85 : vector<16x16xf32> to vector<16x16xbf16>
    %88 = arith.truncf %86 : vector<16x16xf32> to vector<16x16xbf16>
    %cst_25 = arith.constant dense<0.000000e+00> : vector<16x16xf32>
    %89 = tpu.matmul %87, %88, %cst_25 {dimension_numbers = #tpu.dot_dimension_numbers<[1], [0], [0], [1], [0, 0, 1, 1], [], []>} : vector<16x16xbf16>, vector<16x16xbf16>, vector<16x16xf32> -> vector<16x16xf32>
    %90 = vector.extract_strided_slice %13 {offsets = [0, 48], sizes = [16, 16], strides = [1, 1]} : vector<16x64xf32> to vector<16x16xf32>
    %91 = vector.extract_strided_slice %14 {offsets = [0, 48], sizes = [16, 16], strides = [1, 1]} : vector<16x64xf32> to vector<16x16xf32>
    %92 = tpu.transpose %91, [1, 0] : vector<16x16xf32> -> vector<16x16xf32>
    %93 = arith.truncf %90 : vector<16x16xf32> to vector<16x16xbf16>
    %94 = arith.truncf %92 : vector<16x16xf32> to vector<16x16xbf16>
    %cst_26 = arith.constant dense<0.000000e+00> : vector<16x16xf32>
    %95 = tpu.matmul %93, %94, %cst_26 {dimension_numbers = #tpu.dot_dimension_numbers<[1], [0], [0], [1], [0, 0, 1, 1], [], []>} : vector<16x16xbf16>, vector<16x16xbf16>, vector<16x16xf32> -> vector<16x16xf32>
    %cst_27 = arith.constant 2.500000e-01 : f32
    %96 = vector.broadcast %cst_27 : f32 to vector<16x16xf32>
    %97 = arith.mulf %95, %96 : vector<16x16xf32>
    %98 = vector.broadcast %17 : vector<1x16xf32> to vector<16x16xf32>
    %99 = arith.addf %97, %98 : vector<16x16xf32>
    %cst_28 = arith.constant dense<0xFF800000> : vector<16xf32>
    %100 = vector.multi_reduction <maximumf>, %99, %cst_28 [1] : vector<16x16xf32> to vector<16xf32>
    %101 = vector.shape_cast %100 : vector<16xf32> to vector<16x1xf32>
    %102 = vector.broadcast %101 : vector<16x1xf32> to vector<16x16xf32>
    %103 = arith.subf %99, %102 : vector<16x16xf32>
    %104 = math.exp %103 : vector<16x16xf32>
    %cst_29 = arith.constant dense<0.000000e+00> : vector<16xf32>
    %105 = vector.multi_reduction <add>, %104, %cst_29 [1] : vector<16x16xf32> to vector<16xf32>
    %106 = vector.shape_cast %105 : vector<16xf32> to vector<16x1xf32>
    %107 = tpu.reciprocal %106 {approx = true} : vector<16x1xf32> -> vector<16x1xf32>
    %108 = vector.broadcast %107 : vector<16x1xf32> to vector<16x16xf32>
    %109 = arith.mulf %104, %108 : vector<16x16xf32>
    %110 = vector.extract_strided_slice %15 {offsets = [0, 48], sizes = [16, 16], strides = [1, 1]} : vector<16x64xf32> to vector<16x16xf32>
    %111 = arith.truncf %109 : vector<16x16xf32> to vector<16x16xbf16>
    %112 = arith.truncf %110 : vector<16x16xf32> to vector<16x16xbf16>
    %cst_30 = arith.constant dense<0.000000e+00> : vector<16x16xf32>
    %113 = tpu.matmul %111, %112, %cst_30 {dimension_numbers = #tpu.dot_dimension_numbers<[1], [0], [0], [1], [0, 0, 1, 1], [], []>} : vector<16x16xbf16>, vector<16x16xbf16>, vector<16x16xf32> -> vector<16x16xf32>
    %114 = tpu.concatenate %41, %65, %89, %113 in 1 : vector<16x16xf32>, vector<16x16xf32>, vector<16x16xf32>, vector<16x16xf32> -> vector<16x64xf32>
    %c0_31 = arith.constant 0 : index
    %c0_32 = arith.constant 0 : index
    %c0_33 = arith.constant 0 : index
    %115 = vector.load %arg9[%c0_31, %c0_32, %c0_33] : memref<1x64x64xf32, #tpu.memory_space<vmem>>, vector<1x64x64xf32>
    %116 = vector.shape_cast %115 : vector<1x64x64xf32> to vector<64x64xf32>
    %117 = arith.truncf %114 : vector<16x64xf32> to vector<16x64xbf16>
    %118 = arith.truncf %116 : vector<64x64xf32> to vector<64x64xbf16>
    %cst_34 = arith.constant dense<0.000000e+00> : vector<16x64xf32>
    %119 = tpu.matmul %117, %118, %cst_34 {dimension_numbers = #tpu.dot_dimension_numbers<[1], [0], [0], [1], [0, 0, 1, 1], [], []>} : vector<16x64xbf16>, vector<64x64xbf16>, vector<16x64xf32> -> vector<16x64xf32>
    %c0_35 = arith.constant 0 : index
    %c0_36 = arith.constant 0 : index
    %c0_37 = arith.constant 0 : index
    %120 = vector.load %arg10[%c0_35, %c0_36, %c0_37] : memref<1x1x64xf32, #tpu.memory_space<vmem>>, vector<1x1x64xf32>
    %121 = vector.shape_cast %120 : vector<1x1x64xf32> to vector<1x64xf32>
    %122 = vector.broadcast %121 : vector<1x64xf32> to vector<16x64xf32>
    %123 = arith.addf %119, %122 : vector<16x64xf32>
    %124 = arith.addf %3, %123 : vector<16x64xf32>
    %c0_38 = arith.constant 0 : index
    %c0_39 = arith.constant 0 : index
    %c0_40 = arith.constant 0 : index
    %125 = vector.load %arg11[%c0_38, %c0_39, %c0_40] : memref<1x1x64xf32, #tpu.memory_space<vmem>>, vector<1x1x64xf32>
    %126 = vector.shape_cast %125 : vector<1x1x64xf32> to vector<1x64xf32>
    %c0_41 = arith.constant 0 : index
    %c0_42 = arith.constant 0 : index
    %c0_43 = arith.constant 0 : index
    %127 = vector.load %arg12[%c0_41, %c0_42, %c0_43] : memref<1x1x64xf32, #tpu.memory_space<vmem>>, vector<1x1x64xf32>
    %128 = vector.shape_cast %127 : vector<1x1x64xf32> to vector<1x64xf32>
    %cst_44 = arith.constant dense<0.000000e+00> : vector<16xf32>
    %129 = vector.multi_reduction <add>, %124, %cst_44 [1] : vector<16x64xf32> to vector<16xf32>
    %130 = vector.shape_cast %129 : vector<16xf32> to vector<16x1xf32>
    %cst_45 = arith.constant 6.400000e+01 : f32
    %131 = vector.broadcast %cst_45 : f32 to vector<16x1xf32>
    %132 = arith.divf %130, %131 : vector<16x1xf32>
    %133 = vector.broadcast %132 : vector<16x1xf32> to vector<16x64xf32>
    %134 = arith.subf %124, %133 : vector<16x64xf32>
    %135 = arith.mulf %134, %134 : vector<16x64xf32>
    %cst_46 = arith.constant dense<0.000000e+00> : vector<16xf32>
    %136 = vector.multi_reduction <add>, %135, %cst_46 [1] : vector<16x64xf32> to vector<16xf32>
    %137 = vector.shape_cast %136 : vector<16xf32> to vector<16x1xf32>
    %cst_47 = arith.constant 6.400000e+01 : f32
    %138 = vector.broadcast %cst_47 : f32 to vector<16x1xf32>
    %139 = arith.divf %137, %138 : vector<16x1xf32>
    %140 = vector.broadcast %132 : vector<16x1xf32> to vector<16x64xf32>
    %141 = arith.subf %124, %140 : vector<16x64xf32>
    %cst_48 = arith.constant 9.99999974E-6 : f32
    %142 = vector.broadcast %cst_48 : f32 to vector<16x1xf32>
    %143 = arith.addf %139, %142 : vector<16x1xf32>
    %144 = math.rsqrt %143 : vector<16x1xf32>
    %145 = vector.broadcast %144 : vector<16x1xf32> to vector<16x64xf32>
    %146 = arith.mulf %141, %145 : vector<16x64xf32>
    %147 = vector.broadcast %126 : vector<1x64xf32> to vector<16x64xf32>
    %148 = arith.mulf %146, %147 : vector<16x64xf32>
    %149 = vector.broadcast %128 : vector<1x64xf32> to vector<16x64xf32>
    %150 = arith.addf %148, %149 : vector<16x64xf32>
    %c0_49 = arith.constant 0 : index
    %c0_50 = arith.constant 0 : index
    %c0_51 = arith.constant 0 : index
    %151 = vector.load %arg13[%c0_49, %c0_50, %c0_51] : memref<1x64x128xf32, #tpu.memory_space<vmem>>, vector<1x64x128xf32>
    %152 = vector.shape_cast %151 : vector<1x64x128xf32> to vector<64x128xf32>
    %153 = arith.truncf %150 : vector<16x64xf32> to vector<16x64xbf16>
    %154 = arith.truncf %152 : vector<64x128xf32> to vector<64x128xbf16>
    %cst_52 = arith.constant dense<0.000000e+00> : vector<16x128xf32>
    %155 = tpu.matmul %153, %154, %cst_52 {dimension_numbers = #tpu.dot_dimension_numbers<[1], [0], [0], [1], [0, 0, 1, 1], [], []>} : vector<16x64xbf16>, vector<64x128xbf16>, vector<16x128xf32> -> vector<16x128xf32>
    %c0_53 = arith.constant 0 : index
    %c0_54 = arith.constant 0 : index
    %c0_55 = arith.constant 0 : index
    %156 = vector.load %arg14[%c0_53, %c0_54, %c0_55] : memref<1x1x128xf32, #tpu.memory_space<vmem>>, vector<1x1x128xf32>
    %157 = vector.shape_cast %156 : vector<1x1x128xf32> to vector<1x128xf32>
    %158 = vector.broadcast %157 : vector<1x128xf32> to vector<16x128xf32>
    %159 = arith.addf %155, %158 : vector<16x128xf32>
    %160 = arith.mulf %159, %159 : vector<16x128xf32>
    %161 = arith.mulf %159, %160 : vector<16x128xf32>
    %cst_56 = arith.constant 4.471500e-02 : f32
    %162 = vector.broadcast %cst_56 : f32 to vector<16x128xf32>
    %163 = arith.mulf %162, %161 : vector<16x128xf32>
    %164 = arith.addf %159, %163 : vector<16x128xf32>
    %cst_57 = arith.constant 0.797884583 : f32
    %165 = vector.broadcast %cst_57 : f32 to vector<16x128xf32>
    %166 = arith.mulf %165, %164 : vector<16x128xf32>
    %167 = math.tanh %166 : vector<16x128xf32>
    %cst_58 = arith.constant 1.000000e+00 : f32
    %168 = vector.broadcast %cst_58 : f32 to vector<16x128xf32>
    %169 = arith.addf %168, %167 : vector<16x128xf32>
    %cst_59 = arith.constant 5.000000e-01 : f32
    %170 = vector.broadcast %cst_59 : f32 to vector<16x128xf32>
    %171 = arith.mulf %170, %169 : vector<16x128xf32>
    %172 = arith.mulf %159, %171 : vector<16x128xf32>
    %c0_60 = arith.constant 0 : index
    %c0_61 = arith.constant 0 : index
    %c0_62 = arith.constant 0 : index
    %173 = vector.load %arg15[%c0_60, %c0_61, %c0_62] : memref<1x128x64xf32, #tpu.memory_space<vmem>>, vector<1x128x64xf32>
    %174 = vector.shape_cast %173 : vector<1x128x64xf32> to vector<128x64xf32>
    %175 = arith.truncf %172 : vector<16x128xf32> to vector<16x128xbf16>
    %176 = arith.truncf %174 : vector<128x64xf32> to vector<128x64xbf16>
    %cst_63 = arith.constant dense<0.000000e+00> : vector<16x64xf32>
    %177 = tpu.matmul %175, %176, %cst_63 {dimension_numbers = #tpu.dot_dimension_numbers<[1], [0], [0], [1], [0, 0, 1, 1], [], []>} : vector<16x128xbf16>, vector<128x64xbf16>, vector<16x64xf32> -> vector<16x64xf32>
    %c0_64 = arith.constant 0 : index
    %c0_65 = arith.constant 0 : index
    %c0_66 = arith.constant 0 : index
    %178 = vector.load %arg16[%c0_64, %c0_65, %c0_66] : memref<1x1x64xf32, #tpu.memory_space<vmem>>, vector<1x1x64xf32>
    %179 = vector.shape_cast %178 : vector<1x1x64xf32> to vector<1x64xf32>
    %180 = vector.broadcast %179 : vector<1x64xf32> to vector<16x64xf32>
    %181 = arith.addf %177, %180 : vector<16x64xf32>
    %182 = arith.addf %150, %181 : vector<16x64xf32>
    %c0_67 = arith.constant 0 : index
    %c0_68 = arith.constant 0 : index
    %c0_69 = arith.constant 0 : index
    %183 = vector.load %arg17[%c0_67, %c0_68, %c0_69] : memref<1x1x64xf32, #tpu.memory_space<vmem>>, vector<1x1x64xf32>
    %184 = vector.shape_cast %183 : vector<1x1x64xf32> to vector<1x64xf32>
    %c0_70 = arith.constant 0 : index
    %c0_71 = arith.constant 0 : index
    %c0_72 = arith.constant 0 : index
    %185 = vector.load %arg18[%c0_70, %c0_71, %c0_72] : memref<1x1x64xf32, #tpu.memory_space<vmem>>, vector<1x1x64xf32>
    %186 = vector.shape_cast %185 : vector<1x1x64xf32> to vector<1x64xf32>
    %cst_73 = arith.constant dense<0.000000e+00> : vector<16xf32>
    %187 = vector.multi_reduction <add>, %182, %cst_73 [1] : vector<16x64xf32> to vector<16xf32>
    %188 = vector.shape_cast %187 : vector<16xf32> to vector<16x1xf32>
    %cst_74 = arith.constant 6.400000e+01 : f32
    %189 = vector.broadcast %cst_74 : f32 to vector<16x1xf32>
    %190 = arith.divf %188, %189 : vector<16x1xf32>
    %191 = vector.broadcast %190 : vector<16x1xf32> to vector<16x64xf32>
    %192 = arith.subf %182, %191 : vector<16x64xf32>
    %193 = arith.mulf %192, %192 : vector<16x64xf32>
    %cst_75 = arith.constant dense<0.000000e+00> : vector<16xf32>
    %194 = vector.multi_reduction <add>, %193, %cst_75 [1] : vector<16x64xf32> to vector<16xf32>
    %195 = vector.shape_cast %194 : vector<16xf32> to vector<16x1xf32>
    %cst_76 = arith.constant 6.400000e+01 : f32
    %196 = vector.broadcast %cst_76 : f32 to vector<16x1xf32>
    %197 = arith.divf %195, %196 : vector<16x1xf32>
    %198 = vector.broadcast %190 : vector<16x1xf32> to vector<16x64xf32>
    %199 = arith.subf %182, %198 : vector<16x64xf32>
    %cst_77 = arith.constant 9.99999974E-6 : f32
    %200 = vector.broadcast %cst_77 : f32 to vector<16x1xf32>
    %201 = arith.addf %197, %200 : vector<16x1xf32>
    %202 = math.rsqrt %201 : vector<16x1xf32>
    %203 = vector.broadcast %202 : vector<16x1xf32> to vector<16x64xf32>
    %204 = arith.mulf %199, %203 : vector<16x64xf32>
    %205 = vector.broadcast %184 : vector<1x64xf32> to vector<16x64xf32>
    %206 = arith.mulf %204, %205 : vector<16x64xf32>
    %207 = vector.broadcast %186 : vector<1x64xf32> to vector<16x64xf32>
    %208 = arith.addf %206, %207 : vector<16x64xf32>
    %c0_78 = arith.constant 0 : index
    %c0_79 = arith.constant 0 : index
    %209 = vector.load %arg24[%c0_78, %c0_79] : memref<16x64xf32, #tpu.memory_space<vmem>>, vector<16x64xf32>
    tpu.vector_store %arg24[%c0_78, %c0_79], %208 {strides = array<i32>} : memref<16x64xf32, #tpu.memory_space<vmem>>, vector<16x64xf32>,
    %c1_i32 = arith.constant 1 : i32
    %210 = arith.cmpi eq, %arg1, %c1_i32 : i32
    %211 = arith.extui %210 : i1 to i32
    %c0_i32_80 = arith.constant 0 : i32
    %212 = arith.cmpi ne, %211, %c0_i32_80 : i32
    scf.if %212 {
      %c0_81 = arith.constant 0 : index
      %c0_82 = arith.constant 0 : index
      %c0_83 = arith.constant 0 : index
      %213 = vector.load %arg4[%c0_81, %c0_82, %c0_83] : memref<1x16x1xf32, #tpu.memory_space<vmem>>, vector<1x16x1xf32>
      %214 = vector.shape_cast %213 : vector<1x16x1xf32> to vector<16x1xf32>
      %215 = vector.extract_strided_slice %208 {offsets = [0, 0], sizes = [1, 64], strides = [1, 1]} : vector<16x64xf32> to vector<1x64xf32>
      %216 = vector.broadcast %214 : vector<16x1xf32> to vector<16x64xf32>
      %217 = arith.mulf %208, %216 : vector<16x64xf32>
      %cst_84 = arith.constant dense<0.000000e+00> : vector<64xf32>
      %218 = vector.multi_reduction <add>, %217, %cst_84 [0] : vector<16x64xf32> to vector<64xf32>
      %219 = vector.shape_cast %218 : vector<64xf32> to vector<1x64xf32>
      %cst_85 = arith.constant dense<0.000000e+00> : vector<1xf32>
      %220 = vector.multi_reduction <add>, %214, %cst_85 [0] : vector<16x1xf32> to vector<1xf32>
      %221 = vector.shape_cast %220 : vector<1xf32> to vector<1x1xf32>
      %cst_86 = arith.constant 1.000000e+00 : f32
      %222 = vector.broadcast %cst_86 : f32 to vector<1x1xf32>
      %223 = arith.maximumf %221, %222 : vector<1x1xf32>
      %224 = vector.broadcast %223 : vector<1x1xf32> to vector<1x64xf32>
      %225 = arith.divf %219, %224 : vector<1x64xf32>
      %226 = tpu.concatenate %215, %225 in 1 : vector<1x64xf32>, vector<1x64xf32> -> vector<1x128xf32>
      %c0_87 = arith.constant 0 : index
      %c0_88 = arith.constant 0 : index
      %227 = vector.load %arg19[%c0_87, %c0_88] : memref<1x128xf32, #tpu.memory_space<vmem>>, vector<1x128xf32>
      %c0_89 = arith.constant 0 : index
      %c0_90 = arith.constant 0 : index
      %228 = vector.load %arg20[%c0_89, %c0_90] : memref<1x128xf32, #tpu.memory_space<vmem>>, vector<1x128xf32>
      %cst_91 = arith.constant dense<0.000000e+00> : vector<1xf32>
      %229 = vector.multi_reduction <add>, %226, %cst_91 [1] : vector<1x128xf32> to vector<1xf32>
      %230 = vector.shape_cast %229 : vector<1xf32> to vector<1x1xf32>
      %cst_92 = arith.constant 1.280000e+02 : f32
      %231 = vector.broadcast %cst_92 : f32 to vector<1x1xf32>
      %232 = arith.divf %230, %231 : vector<1x1xf32>
      %233 = vector.broadcast %232 : vector<1x1xf32> to vector<1x128xf32>
      %234 = arith.subf %226, %233 : vector<1x128xf32>
      %235 = arith.mulf %234, %234 : vector<1x128xf32>
      %cst_93 = arith.constant dense<0.000000e+00> : vector<1xf32>
      %236 = vector.multi_reduction <add>, %235, %cst_93 [1] : vector<1x128xf32> to vector<1xf32>
      %237 = vector.shape_cast %236 : vector<1xf32> to vector<1x1xf32>
      %cst_94 = arith.constant 1.280000e+02 : f32
      %238 = vector.broadcast %cst_94 : f32 to vector<1x1xf32>
      %239 = arith.divf %237, %238 : vector<1x1xf32>
      %240 = vector.broadcast %232 : vector<1x1xf32> to vector<1x128xf32>
      %241 = arith.subf %226, %240 : vector<1x128xf32>
      %cst_95 = arith.constant 9.99999974E-6 : f32
      %242 = vector.broadcast %cst_95 : f32 to vector<1x1xf32>
      %243 = arith.addf %239, %242 : vector<1x1xf32>
      %244 = math.rsqrt %243 : vector<1x1xf32>
      %245 = vector.broadcast %244 : vector<1x1xf32> to vector<1x128xf32>
      %246 = arith.mulf %241, %245 : vector<1x128xf32>
      %247 = arith.mulf %246, %227 : vector<1x128xf32>
      %248 = arith.addf %247, %228 : vector<1x128xf32>
      %c0_96 = arith.constant 0 : index
      %c0_97 = arith.constant 0 : index
      %249 = vector.load %arg21[%c0_96, %c0_97] : memref<1x128xf32, #tpu.memory_space<vmem>>, vector<1x128xf32>
      %250 = arith.mulf %248, %249 : vector<1x128xf32>
      %cst_98 = arith.constant dense<0.000000e+00> : vector<1xf32>
      %251 = vector.multi_reduction <add>, %250, %cst_98 [1] : vector<1x128xf32> to vector<1xf32>
      %252 = vector.shape_cast %251 : vector<1xf32> to vector<1x1xf32>
      %c0_99 = arith.constant 0 : index
      %c0_100 = arith.constant 0 : index
      %253 = vector.load %arg22[%c0_99, %c0_100] : memref<1x1xf32, #tpu.memory_space<vmem>>, vector<1x1xf32>
      %254 = arith.addf %252, %253 : vector<1x1xf32>
      %c0_101 = arith.constant 0 : index
      %c0_102 = arith.constant 0 : index
      %c0_103 = arith.constant 0 : index
      %255 = vector.load %arg23[%c0_101, %c0_102, %c0_103] : memref<1x1x1xf32, #tpu.memory_space<vmem>>, vector<1x1x1xf32>
      %256 = vector.shape_cast %255 : vector<1x1x1xf32> to vector<1x1xf32>
      %257 = vector.shape_cast %254 : vector<1x1xf32> to vector<1x1x1xf32>
      tpu.vector_store %arg23[%c0_101, %c0_102, %c0_103], %257 {strides = array<i32>} : memref<1x1x1xf32, #tpu.memory_space<vmem>>, vector<1x1x1xf32>,
    } else {
    }
    return
  }
  func.func @transform_0(%arg0: i32, %arg1: i32) -> (i32, i32, i32) {
    %c0_i32 = arith.constant 0 : i32
    %c0_i32_0 = arith.constant 0 : i32
    %c0_i32_1 = arith.constant 0 : i32
    return %arg0, %c0_i32, %c0_i32_0 : i32, i32, i32
  }
  func.func @transform_1(%arg0: i32, %arg1: i32) -> (i32, i32, i32) {
    %c0_i32 = arith.constant 0 : i32
    %c0_i32_0 = arith.constant 0 : i32
    %c0_i32_1 = arith.constant 0 : i32
    return %arg0, %c0_i32, %c0_i32_0 : i32, i32, i32
  }
  func.func @transform_2(%arg0: i32, %arg1: i32) -> (i32, i32, i32) {
    %c0_i32 = arith.constant 0 : i32
    %c0_i32_0 = arith.constant 0 : i32
    %c0_i32_1 = arith.constant 0 : i32
    return %arg0, %c0_i32, %c0_i32_0 : i32, i32, i32
  }
  func.func @transform_3(%arg0: i32, %arg1: i32) -> (i32, i32) {
    %c0_i32 = arith.constant 0 : i32
    %c0_i32_0 = arith.constant 0 : i32
    %c0_i32_1 = arith.constant 0 : i32
    return %c0_i32, %c0_i32_0 : i32, i32
  }
  func.func @transform_4(%arg0: i32, %arg1: i32) -> (i32, i32) {
    %c0_i32 = arith.constant 0 : i32
    %c0_i32_0 = arith.constant 0 : i32
    %c0_i32_1 = arith.constant 0 : i32
    return %c0_i32, %c0_i32_0 : i32, i32
  }
  func.func @transform_5(%arg0: i32, %arg1: i32) -> (i32, i32, i32) {
    %c0_i32 = arith.constant 0 : i32
    %c0_i32_0 = arith.constant 0 : i32
    %c0_i32_1 = arith.constant 0 : i32
    return %arg1, %c0_i32, %c0_i32_0 : i32, i32, i32
  }
  func.func @transform_6(%arg0: i32, %arg1: i32) -> (i32, i32, i32) {
    %c0_i32 = arith.constant 0 : i32
    %c0_i32_0 = arith.constant 0 : i32
    %c0_i32_1 = arith.constant 0 : i32
    return %arg1, %c0_i32, %c0_i32_0 : i32, i32, i32
  }
  func.func @transform_7(%arg0: i32, %arg1: i32) -> (i32, i32, i32) {
    %c0_i32 = arith.constant 0 : i32
    %c0_i32_0 = arith.constant 0 : i32
    %c0_i32_1 = arith.constant 0 : i32
    return %arg1, %c0_i32, %c0_i32_0 : i32, i32, i32
  }
  func.func @transform_8(%arg0: i32, %arg1: i32) -> (i32, i32, i32) {
    %c0_i32 = arith.constant 0 : i32
    %c0_i32_0 = arith.constant 0 : i32
    %c0_i32_1 = arith.constant 0 : i32
    return %arg1, %c0_i32, %c0_i32_0 : i32, i32, i32
  }
  func.func @transform_9(%arg0: i32, %arg1: i32) -> (i32, i32, i32) {
    %c0_i32 = arith.constant 0 : i32
    %c0_i32_0 = arith.constant 0 : i32
    %c0_i32_1 = arith.constant 0 : i32
    return %arg1, %c0_i32, %c0_i32_0 : i32, i32, i32
  }
  func.func @transform_10(%arg0: i32, %arg1: i32) -> (i32, i32, i32) {
    %c0_i32 = arith.constant 0 : i32
    %c0_i32_0 = arith.constant 0 : i32
    %c0_i32_1 = arith.constant 0 : i32
    return %arg1, %c0_i32, %c0_i32_0 : i32, i32, i32
  }
  func.func @transform_11(%arg0: i32, %arg1: i32) -> (i32, i32, i32) {
    %c0_i32 = arith.constant 0 : i32
    %c0_i32_0 = arith.constant 0 : i32
    %c0_i32_1 = arith.constant 0 : i32
    return %arg1, %c0_i32, %c0_i32_0 : i32, i32, i32
  }
  func.func @transform_12(%arg0: i32, %arg1: i32) -> (i32, i32, i32) {
    %c0_i32 = arith.constant 0 : i32
    %c0_i32_0 = arith.constant 0 : i32
    %c0_i32_1 = arith.constant 0 : i32
    return %arg1, %c0_i32, %c0_i32_0 : i32, i32, i32
  }
  func.func @transform_13(%arg0: i32, %arg1: i32) -> (i32, i32, i32) {
    %c0_i32 = arith.constant 0 : i32
    %c0_i32_0 = arith.constant 0 : i32
    %c0_i32_1 = arith.constant 0 : i32
    return %arg1, %c0_i32, %c0_i32_0 : i32, i32, i32
  }
  func.func @transform_14(%arg0: i32, %arg1: i32) -> (i32, i32, i32) {
    %c0_i32 = arith.constant 0 : i32
    %c0_i32_0 = arith.constant 0 : i32
    %c0_i32_1 = arith.constant 0 : i32
    return %arg1, %c0_i32, %c0_i32_0 : i32, i32, i32
  }
  func.func @transform_15(%arg0: i32, %arg1: i32) -> (i32, i32, i32) {
    %c0_i32 = arith.constant 0 : i32
    %c0_i32_0 = arith.constant 0 : i32
    %c0_i32_1 = arith.constant 0 : i32
    return %arg1, %c0_i32, %c0_i32_0 : i32, i32, i32
  }
  func.func @transform_16(%arg0: i32, %arg1: i32) -> (i32, i32, i32) {
    %c0_i32 = arith.constant 0 : i32
    %c0_i32_0 = arith.constant 0 : i32
    %c0_i32_1 = arith.constant 0 : i32
    return %arg1, %c0_i32, %c0_i32_0 : i32, i32, i32
  }
  func.func @transform_17(%arg0: i32, %arg1: i32) -> (i32, i32) {
    %c0_i32 = arith.constant 0 : i32
    %c0_i32_0 = arith.constant 0 : i32
    %c0_i32_1 = arith.constant 0 : i32
    return %c0_i32, %c0_i32_0 : i32, i32
  }
  func.func @transform_18(%arg0: i32, %arg1: i32) -> (i32, i32) {
    %c0_i32 = arith.constant 0 : i32
    %c0_i32_0 = arith.constant 0 : i32
    %c0_i32_1 = arith.constant 0 : i32
    return %c0_i32, %c0_i32_0 : i32, i32
  }
  func.func @transform_19(%arg0: i32, %arg1: i32) -> (i32, i32) {
    %c0_i32 = arith.constant 0 : i32
    %c0_i32_0 = arith.constant 0 : i32
    %c0_i32_1 = arith.constant 0 : i32
    return %c0_i32, %c0_i32_0 : i32, i32
  }
  func.func @transform_20(%arg0: i32, %arg1: i32) -> (i32, i32) {
    %c0_i32 = arith.constant 0 : i32
    %c0_i32_0 = arith.constant 0 : i32
    %c0_i32_1 = arith.constant 0 : i32
    return %c0_i32, %c0_i32_0 : i32, i32
  }
  func.func @transform_21(%arg0: i32, %arg1: i32) -> (i32, i32, i32) {
    %c0_i32 = arith.constant 0 : i32
    %c0_i32_0 = arith.constant 0 : i32
    %c0_i32_1 = arith.constant 0 : i32
    return %arg0, %c0_i32, %c0_i32_0 : i32, i32, i32
  }
}

</mosaic_0001>

<bundles_post_ra>
// kernel: longformer_cross_encoder.1
= control target key start
LH: loop header
LB: loop body
LE: loop exit
PB: predicated region body
PF: predicated region fallthrough
CT: control target
= control target key end

     0   :  { %s2431_s26 = smov 0   ;;  %s2433_s27 = smov 0   ;;  %s2781_s0 = inlined_call_operand.vmem [shape: f32[2,16,64], index: 0, kind: input, shape index: {}]   ;;  %s2782_s1 = inlined_call_operand.vmem [shape: f32[2,1,16], index: 1, kind: input, shape index: {}]   ;;  %s2783_s2 = inlined_call_operand.vmem [shape: f32[2,16,1], index: 2, kind: input, shape index: {}]   ;;  %s2784_s3 = inlined_call_operand.vmem [shape: f32[1,64], index: 3, kind: input, shape index: {}]   ;;  %s2785_s4 = inlined_call_operand.vmem [shape: f32[1,64], index: 4, kind: input, shape index: {}]   ;;  %s2786_s5 = inlined_call_operand.vmem [shape: f32[2,64,192], index: 5, kind: input, shape index: {}]   ;;  %s2787_s6 = inlined_call_operand.vmem [shape: f32[2,1,192], index: 6, kind: input, shape index: {}]   ;;  %s2788_s7 = inlined_call_operand.vmem [shape: f32[2,64,64], index: 7, kind: input, shape index: {}]   ;;  %s2789_s8 = inlined_call_operand.vmem [shape: f32[2,1,64], index: 8, kind: input, shape index: {}]   ;;  %s2790_s9 = inlined_call_operand.vmem [shape: f32[2,1,64], index: 9, kind: input, shape index: {}]   ;;  %s2791_s10 = inlined_call_operand.vmem [shape: f32[2,1,64], index: 10, kind: input, shape index: {}]   ;;  %s2792_s11 = inlined_call_operand.vmem [shape: f32[2,64,128], index: 11, kind: input, shape index: {}]   ;;  %s2793_s12 = inlined_call_operand.vmem [shape: f32[2,1,128], index: 12, kind: input, shape index: {}]   ;;  %s2794_s13 = inlined_call_operand.vmem [shape: f32[2,128,64], index: 13, kind: input, shape index: {}]   ;;  %s2795_s14 = inlined_call_operand.vmem [shape: f32[2,1,64], index: 14, kind: input, shape index: {}]   ;;  %s2796_s15 = inlined_call_operand.vmem [shape: f32[2,1,64], index: 15, kind: input, shape index: {}]   ;;  %s2797_s16 = inlined_call_operand.vmem [shape: f32[2,1,64], index: 16, kind: input, shape index: {}]   ;;  %s2798_s17 = inlined_call_operand.vmem [shape: f32[1,128], index: 17, kind: input, shape index: {}]   ;;  %s2799_s18 = inlined_call_operand.vmem [shape: f32[1,128], index: 18, kind: input, shape index: {}]   ;;  %s2800_s19 = inlined_call_operand.vmem [shape: f32[1,128], index: 19, kind: input, shape index: {}]   ;;  %s2801_s20 = inlined_call_operand.<no memory space> [shape: f32[1,1], index: 20, kind: input, shape index: {}]   ;;  %s2802_s21 = inlined_call_operand.vmem [shape: f32[2,1,1], index: 21, kind: output, shape index: {}]  }
   0x1   :  { %2808 = sst [smem:[#allocation11_spill]] %s2781_s0  ;;  %v26_v0 = vstv %s2801_s20  ;;  %s2437_s28 = smov 0  }
   0x2   :  { %2809 = sst [smem:[#allocation12_spill]] %s2782_s1  ;;  %27 = vst [vmem:[#allocation3] sm:$0x1] %v26_v0  ;;  %s2439_s29 = smov 0  }
   0x3   :  { %2810 = sst [smem:[#allocation13_spill]] %s2783_s2 }
   0x4   :  { %2811 = sst [smem:[#allocation14_spill]] %s2784_s3  ;;  %s2435_s3 = smov 0  }
   0x5   :  { %2812 = sst [smem:[#allocation15_spill]] %s2785_s4 }
   0x6   :  { %2813 = sst [smem:[#allocation16_spill]] %s2786_s5 }
   0x7   :  { %2814 = sst [smem:[#allocation17_spill]] %s2787_s6 }
   0x8   :  { %2815 = sst [smem:[#allocation18_spill]] %s2788_s7 }
   0x9   :  { %2816 = sst [smem:[#allocation19_spill]] %s2791_s10 }
   0xa   :  { %2817 = sst [smem:[#allocation20_spill]] %s2792_s11 }
   0xb   :  { %2818 = sst [smem:[#allocation21_spill]] %s2793_s12 }
   0xc   :  { %2819 = sst [smem:[#allocation22_spill]] %s2797_s16 }
   0xd   :  { %2820 = sst [smem:[#allocation23_spill]] %s2798_s17 }
   0xe   :  { %2821 = sst [smem:[#allocation24_spill]] %s2799_s18 }
   0xf   :  { %2822 = sst [smem:[#allocation25_spill]] %s2800_s19 }
  0x10   :  { %2823 = sst [smem:[#allocation26_spill]] %s2802_s21 }
  0x11 LB: > { %2824 = sst [smem:[#allocation4_spill]] %s2288_s26  ;;  %s42_s20 = sadd.s32 1, %s2296_s3  ;;  %s2304_s29 = sphi %s2439_s29, %s33_s29   ;;  %s2300_s28 = sphi %s2437_s28, %s2864_s28   ;;  %s2296_s3 = sphi %s2435_s3, %s2863_s3   ;;  %s2292_s27 = sphi %s2433_s27, %s2862_s27   ;;  %s2288_s26 = sphi %s2431_s26, %s2861_s26  }
  0x12   : > { %2825 = sst [smem:[#allocation5_spill]] %s2296_s3  ;;  %s45_s0 = sadd.s32 1, %s2300_s28 }
  0x13   : > { %2826 = sst [smem:[#allocation6_spill]] %s2300_s28  ;;  %p43_p0 = scmp.ge.s32.totalorder %s42_s20, 2 }
  0x14   : > { %2827 = sst [smem:[#allocation7_spill]] %s2304_s29  ;;  %p2058_p1 = scmp.ge.s32.totalorder %s2304_s29, 1 }
  0x15   : > { %p724_p2 = scmp.lt.s32.totalorder %s2304_s29, 5  ;;  %s2866_s20 = smov (%p43_p0, %s42_s20), 0 }
  0x16   : > { %2828 = sst [smem:[#allocation8_spill]] %s2866_s20  ;;  %s2868_s0 = smov (!%p43_p0, %s45_s0), %s2300_s28 }
  0x17   : > { %p725_p3 = pnand %p2058_p1, %p724_p2  ;;  %p47_p4 = scmp.ge.s32.totalorder %s2868_s0, 2 }
  0x19   : > { %s2870_s0 = smov (%p47_p4, %s2868_s0), 0  ;;  %728 = sbr.rel (%p725_p3) target bundleno = 3138 (0xc42), region = 104 }
  0x1a   : > { %2829 = sst [smem:[#allocation9_spill]] %s2870_s0 }
  0x1e   : > { %p835_p5 = scmp.lt.s32.totalorder %s2292_s27, 1  ;;  %p848_p6 = scmp.lt.s32.totalorder %s2288_s26, 1 }
  0x1f   : > { %s2831_s25 = sld [smem:[#allocation11_spill]] }
  0x20   : > { %s2872_s27 = smov (!%p835_p5, %s2292_s27), 1  ;;  %s2832_s3 = sld [smem:[#allocation13_spill]] }
  0x21   : > { %s2467_s4 = scalar_select %p848_p6, %s2288_s26, 1 }
  0x22   : > { %s2088_s30 = sshll.u32 %s2872_s27, 4  ;;  %s2834_s21 = sld [smem:[#allocation16_spill]] }
  0x23   : > { %s2090_s19 = sshll.u32 %s2467_s4, 7  ;;  %s2065_s18 = sshll.u32 %s2467_s4, 1 }
  0x24   : > { %s2835_s6 = sld [smem:[#allocation17_spill]]  ;;  %s2091_s2 = sshll.u32 %s2467_s4, 6 }
  0x25   : > { %s839_s0 = scalar_lea.vmem %s2831_s25, %s2088_s30  ;;  %s2836_s7 = sld [smem:[#allocation18_spill]] }
  0x26   : > { %s2480_s29 = scalar_lea.vmem %s2832_s3, %s2088_s30  ;;  %s2838_s11 = sld [smem:[#allocation20_spill]] }
  0x27   : > { %2833 = sst [smem:[#allocation10_spill]] %s2480_s29  ;;  %s886_s17 = scalar_lea.vmem %s2795_s14, %s2467_s4 }
  0x28   : > { %s2487_s5 = scalar_lea.vmem %s2834_s21, %s2090_s19  ;;  %s889_s22 = scalar_lea.vmem %s2796_s15, %s2467_s4 }
  0x29   : > { %s2840_s23 = sld [smem:[#allocation22_spill]] }
  0x2a   : > { %s2492_s24 = scalar_lea.vmem %s2835_s6, %s2065_s18  ;;  %s2841_s25 = sld [smem:[#allocation26_spill]] }
  0x2b   : > { %s2502_s30 = scalar_lea.vmem %s2836_s7, %s2091_s2  ;;  %s2524_s7 = scalar_lea.vmem %s2794_s13, %s2090_s19 }
  0x2c   : > { %s2515_s6 = scalar_lea.vmem %s2838_s11, %s2091_s2  ;;  %s2842_s12 = sld [smem:[#allocation4_spill]] }
  0x2f   : > { %s892_s11 = scalar_lea.vmem %s2840_s23, %s2467_s4 }
  0x30   : > { %s895_s28 = scalar_lea.vmem %s2841_s25, %s2872_s27 }
  0x32   : > { %p2072_p7 = scmp.ne.s32.totalorder %s2842_s12, 0 }
  0x33   : > { %s2843_s19 = sld [smem:[#allocation14_spill]] (!%p2072_p7) }
  0x34   : > { %900 = sbr.rel (%p2072_p7) target bundleno = 335 (0x14f), region = 108  ;;  %s2844_s20 = sld [smem:[#allocation15_spill]] (!%p2072_p7) }
  0x39   : > { %v901_v1 = vld [vmem:[%s839_s0] sm:$0xff]  ;;  %vm905_vm0 = vcmask 523264   ;;  %v902_v3 = vld [vmem:[%s839_s0 + $0x8] sm:$0xff]  ;;  %v2306_v5 = vmov 64.0  }
  0x3a   : > { %v906_v2 = vsel %vm905_vm0, %v901_v1, 0.0  ;;  %v909_v4 = vsel %vm905_vm0, %v902_v3, 0.0  ;;  %2149 = vrcp.f32 %v2306_v5  ;;  %v2147_v36 = vld [vmem:[%s2843_s19] ss:$0 sm:$0xff] }
  0x3b   : > { %907 = vadd.xlane.f32.xlu0 %v906_v2  ;;  %v2148_v39 = vld [vmem:[%s2844_s20] ss:$0 sm:$0xff] }
  0x40   : > { %v2150_v6 = vpop.eup %2149 }
  0x41   : > { %v913_v7 = vmul.f32 64.0, %v2150_v6  ;;  %vm917_vm1 = vweird.f32 %v2150_v6 }
  0x43   : > { %910 = vadd.xlane.f32.xlu0 %v909_v4  ;;  %v914_v8 = vsub.f32 1.0, %v913_v7 }
  0x45   : > { %v915_v9 = vmul.f32 %v2150_v6, %v914_v8 }
  0x47   : > { %v916_v10 = vadd.f32 %v2150_v6, %v915_v9 }
  0x49   : > { %v918_v11 = vsel %vm917_vm1, %v2150_v6, %v916_v10 }
  0xae   : > { %v908_v12 = vpop.xlane.xlu0 %907 }
  0xaf   : > { %v919_v13 = vmul.f32 %v918_v11, %v908_v12 }
  0xb1   : > { %v921_v14 = vsub.f32 %v901_v1, %v919_v13 }
  0xb3   : > { %v923_v15 = vmul.f32 %v921_v14, %v921_v14 }
  0xb5   : > { %v925_v16 = vsel %vm905_vm0, %v923_v15, 0.0 }
  0xb6   : > { %926 = vadd.xlane.f32.xlu1 %v925_v16  ;;  %v911_v17 = vpop.xlane.xlu0 %910 }
  0xb7   : > { %v920_v18 = vmul.f32 %v918_v11, %v911_v17 }
  0xb9   : > { %v922_v19 = vsub.f32 %v902_v3, %v920_v18 }
  0xbb   : > { %v924_v20 = vmul.f32 %v922_v19, %v922_v19 }
  0xbd   : > { %v928_v21 = vsel %vm905_vm0, %v924_v20, 0.0 }
  0xbe   : > { %929 = vadd.xlane.f32.xlu1 %v928_v21 }
 0x129   : > { %v927_v22 = vpop.xlane.xlu1 %926 }
 0x12a   : > { %v931_v23 = vmul.f32 %v927_v22, %v918_v11 }
 0x12c   : > { %v933_v24 = vadd.f32 1e-05, %v931_v23 }
 0x12e   : > { %2151 = vrsqrt.f32 %v933_v24  ;;  %vm941_vm3 = vweird.f32 %v933_v24 }
 0x131   : > { %v930_v25 = vpop.xlane.xlu1 %929 }
 0x132   : > { %v932_v26 = vmul.f32 %v930_v25, %v918_v11 }
 0x134   : > { %v2152_v27 = vpop.eup %2151  ;;  %v934_v28 = vadd.f32 1e-05, %v932_v26 }
 0x135   : > { %v936_v29 = vmul.f32 %v2152_v27, %v933_v24  ;;  %vm942_vm2 = vweird.f32 %v2152_v27 }
 0x136   : > { %2153 = vrsqrt.f32 %v934_v28  ;;  %vm943_vm4 = vmor %vm941_vm3, %vm942_vm2  ;;  %vm951_vm6 = vweird.f32 %v934_v28 }
 0x137   : > { %v937_v30 = vmul.f32 %v2152_v27, %v936_v29 }
 0x139   : > { %v938_v31 = vmul.f32 0.5, %v937_v30 }
 0x13b   : > { %v939_v32 = vsub.f32 1.5, %v938_v31 }
 0x13c   : > { %v2154_v33 = vpop.eup %2153 }
 0x13d   : > { %v940_v34 = vmul.f32 %v2152_v27, %v939_v32  ;;  %v946_v35 = vmul.f32 %v2154_v33, %v934_v28  ;;  %vm952_vm5 = vweird.f32 %v2154_v33 }
 0x13e   : > { %vm953_vm7 = vmor %vm951_vm6, %vm952_vm5 }
 0x13f   : > { %v944_v37 = vsel %vm943_vm4, %v2152_v27, %v940_v34  ;;  %v947_v38 = vmul.f32 %v2154_v33, %v946_v35 }
 0x140   : > { %v955_v40 = vmul.f32 %v944_v37, %v921_v14 }
 0x141   : > { %v948_v41 = vmul.f32 0.5, %v947_v38 }
 0x142   : > { %v960_v42 = vmul.f32 %v2147_v36, %v955_v40 }
 0x143   : > { %v949_v43 = vsub.f32 1.5, %v948_v41 }
 0x144   : > { %v965_v44 = vadd.f32 %v2148_v39, %v960_v42 }
 0x145   : > { %v950_v45 = vmul.f32 %v2154_v33, %v949_v43 }
 0x146   : > { %967 = vst.msk [vmem:[#allocation2] sm:$0xff] %vm905_vm0, %v965_v44 }
 0x147   : > { %v954_v46 = vsel %vm953_vm7, %v2154_v33, %v950_v45 }
 0x148   : > { %v956_v47 = vmul.f32 %v954_v46, %v922_v19 }
 0x14a   : > { %v961_v48 = vmul.f32 %v2147_v36, %v956_v47 }
 0x14c   : > { %v966_v49 = vadd.f32 %v2148_v39, %v961_v48 }
 0x14e   : > { %968 = vst.msk [vmem:[#allocation2 + $0x8] sm:$0xff] %vm905_vm0, %v966_v49 }
 0x14f PF: > { %v983_v50 = vld [vmem:[%s2487_s5 + $0x60] sm:$0xff]  ;;  %v985_v51 = vld [vmem:[%s2487_s5 + $0x70] sm:$0xff]  ;;  %vm1002_vm8 = vcmask 523264   ;;  %s2307_s16 = smov 16   ;;  %s2308_s29 = smov 64   ;;  %vm1077_vm9 = vcmask 130048  }
 0x150   : > { %v979_v52 = vld [vmem:[%s2487_s5 + $0x40] sm:$0xff]  ;;  %v994_v53 = vpack.c.bf16 %v985_v51, %v983_v50  ;;  %v981_v54 = vld [vmem:[%s2487_s5 + $0x50] sm:$0xff]  ;;  %s2309_s21 = smov 112   ;;  %s2310_s26 = smov 48   ;;  %v984_v40 = vld [vmem:[%s2487_s5 + $0x68] sm:$0xff]  ;;  %vm1486_vm10 = vcmask 261120  }
 0x151   : > { %v992_v55 = vpack.c.bf16 %v981_v54, %v979_v52  ;;  %v975_v56 = vld [vmem:[%s2487_s5 + $0x20] sm:$0xff]  ;;  %v977_v57 = vld [vmem:[%s2487_s5 + $0x30] sm:$0xff]  ;;  %s2312_s18 = smov 80   ;;  %s2313_s2 = smov 96   ;;  %v986_v41 = vld [vmem:[%s2487_s5 + $0x78] sm:$0xff]  ;;  %vm1489_vm11 = vcmask 392192  }
 0x152   : > { %1010 = vmatpush.bf16.msra.mxu0 %v994_v53  ;;  %v990_v58 = vpack.c.bf16 %v977_v57, %v975_v56  ;;  %v971_v59 = vld [vmem:[%s2487_s5] sm:$0xff]  ;;  %v973_v60 = vld [vmem:[%s2487_s5 + $0x10] sm:$0xff]  ;;  %v995_v42 = vpack.c.bf16 %v986_v41, %v984_v40  ;;  %v980_v43 = vld [vmem:[%s2487_s5 + $0x48] sm:$0xff]  ;;  %s2845_s25 = sld [smem:[#allocation12_spill]]  ;;  %s2847_s12 = scalar_lea.vmem %s2789_s8, %s2467_s4 }
 0x153   : > { %v988_v61 = vpack.c.bf16 %v973_v60, %v971_v59  ;;  %v2563_v62 = vld [vmem:[#allocation2] sm:$0xff]  ;;  %v982_v44 = vld [vmem:[%s2487_s5 + $0x58] sm:$0xff]  ;;  %v976_v46 = vld [vmem:[%s2487_s5 + $0x28] sm:$0xff]  ;;  %s2848_s0 = scalar_lea.vmem %s2790_s9, %s2467_s4 }
 0x154   : > { %v2574_v2 = vld [vmem:[%s2492_s24] sm:$0x3]  ;;  %s2311_s24 = smov 32   ;;  %1024 = vmatpush.bf16.msra.mxu1 %v995_v42  ;;  %v993_v45 = vpack.c.bf16 %v982_v44, %v980_v43  ;;  %v978_v47 = vld [vmem:[%s2487_s5 + $0x38] sm:$0xff]  ;;  %v972_v49 = vld [vmem:[%s2487_s5 + $0x8] sm:$0xff] }
 0x155   : > { %v2565_v63 = vld [vmem:[#allocation2 + $0x8] sm:$0xff]  ;;  %v998_v3 = vperm.slane %v2574_v2, 0  ;;  %v991_v48 = vpack.c.bf16 %v978_v47, %v976_v46  ;;  %v974_v50 = vld [vmem:[%s2487_s5 + $0x18] sm:$0xff] }
 0x156   : > { %1011 = vmatpush.bf16.msra.mxu0 %v992_v55  ;;  %v2569_v0 = vpack.c.bf16 %v2565_v63, %v2563_v62  ;;  %v989_v51 = vpack.c.bf16 %v974_v50, %v972_v49 }
 0x158   : > { %1025 = vmatpush.bf16.msra.mxu1 %v993_v45  ;;  %s2846_s10 = scalar_lea.vmem %s2845_s25, %s2872_s27 }
 0x159   : > { %v2204_v57 = vld [vmem:[%s2846_s10] ss:$0 sm:$0xff] }
 0x15a   : > { %1012 = vmatpush.bf16.msra.mxu0 %v990_v58 }
 0x15c   : > { %1026 = vmatpush.bf16.msra.mxu1 %v991_v48 }
 0x15e   : > { %1013 = vmatpush.bf16.msra.mxu0 %v988_v61 }
 0x160   : > { %1027 = vmatpush.bf16.msra.mxu1 %v989_v51 }
 0x161   : > { %2073 = vmatmul.msk.bf16.vlgmr.msra.gmra.mxu0 %vm1002_vm8, %v2569_v0 }
 0x163   : > { %2074 = vmatmul.msk.bf16.vlgmr.msra.gmra.mxu1 %vm1002_vm8, %v2569_v0 }
 0x1de   : > { %v1015_v1 = vpop.f32.mrf.mxu0 }
 0x1df   : > { %v1016_v5 = vadd.f32 %v1015_v1, %v998_v3 }
 0x1e6   : > { %v1017_v4 = vpop.f32.mrf.mxu0 }
 0x1e7   : > { %v1018_v6 = vadd.f32 %v1017_v4, %v998_v3 }
 0x1e9   : > { %v2165_v7 = vpack.i.bf16 %v1018_v6, %v1016_v5  ;;  %v1075_v8 = vpack.c.bf16 %v1018_v6, %v1016_v5 }
 0x1eb   : > { %2166 = vrot.lane.b32.xlu1 %v2165_v7, %s2307_s16  ;;  %2156 = vrot.lane.b32.xlu0 %v2165_v7, %s2308_s29 }
 0x1ec   : > { %1183 = vrot.lane.b32.xlu2 %v1075_v8, %s2309_s21 }
 0x1f3   : > { %2161 = vrot.lane.b32.xlu0 %v2165_v7, %s2310_s26 }
 0x1f4   : > { %2185 = vrot.lane.b32.xlu2 %v2165_v7, %s2311_s24 }
 0x1fb   : > { %1394 = vrot.lane.b32.xlu0 %v1075_v8, %s2312_s18 }
 0x1fc   : > { %1289 = vrot.lane.b32.xlu2 %v1075_v8, %s2313_s2 }
 0x246   : > { %v1184_v9 = vpop.permute.xlu2 %1183 }
 0x24e   : > { %v2186_v10 = vpop.permute.xlu2 %2185 }
 0x24f   : > { %v2187_v11 = vunpack.i.l.bf16 %v2186_v10  ;;  %v2188_v12 = vunpack.i.h.bf16 %v2186_v10 }
 0x251   : > { %1256 = vxpose.xlu2.b32.start [1/2] (short) (narrow) %v2187_v11, 16 }
 0x256   : > { %v1290_v24 = vpop.permute.xlu2 %1289 }
 0x259   : > { %1257 = vxpose.xlu2.b32.end [2/2] (short) (narrow) %v2188_v12, 16 }
 0x25d   : > { %v2167_v13 = vpop.permute.xlu1 %2166  ;;  %v2157_v14 = vpop.permute.xlu0 %2156 }
 0x25e   : > { %v2168_v15 = vunpack.i.l.bf16 %v2167_v13  ;;  %v2169_v17 = vunpack.i.h.bf16 %v2167_v13  ;;  %v2158_v18 = vunpack.i.l.bf16 %v2157_v14  ;;  %v2159_v22 = vunpack.i.h.bf16 %v2157_v14 }
 0x260   : > { %1361 = vxpose.xlu0.b32.start [1/2] (short) (narrow) %v2168_v15, 16 }
 0x265   : > { %v2162_v16 = vpop.permute.xlu0 %2161 }
 0x266   : > { %v2163_v19 = vunpack.i.l.bf16 %v2162_v16  ;;  %v2164_v21 = vunpack.i.h.bf16 %v2162_v16 }
 0x268   : > { %1362 = vxpose.xlu0.b32.end [2/2] (short) (narrow) %v2169_v17, 16  ;;  %v2170_v20 = vpack.i.bf16 %v2163_v19, %v2158_v18  ;;  %v2172_v23 = vpack.i.bf16 %v2164_v21, %v2159_v22 }
 0x26a   : > { %2171 = vxpose.xlu1.b32.start [1/2] (short) (narrow) %v2170_v20, 16 }
 0x26d   : > { %v1395_v28 = vpop.permute.xlu0 %1394 }
 0x272   : > { %2173 = vxpose.xlu1.b32.end [2/2] (short) (narrow) %v2172_v23, 16 }
 0x2ea   : > { %v1272_v25 = vpop.trf.xlu2 }
 0x2f2   : > { %v1273_v26 = vpop.trf.xlu2 }
 0x2f3   : > { %v1288_v27 = vpack.c.bf16 %v1273_v26, %v1272_v25 }
 0x2f5   : > { %1301 = vmatpush.bf16.msrb.mxu0 %v1288_v27 }
 0x2f8   : > { %2079 = vmatmul.msk.bf16.vlgmr.msrb.gmra.mxu0 %vm1077_vm9, %v1290_v24  ;;  %v1029_v24 = vpop.f32.mrf.mxu1 }
 0x304   : > { %v1377_v29 = vpop.trf.xlu0 }
 0x30c   : > { %v1378_v31 = vpop.trf.xlu0 }
 0x30d   : > { %v1393_v37 = vpack.c.bf16 %v1378_v31, %v1377_v29  ;;  %v999_v29 = vperm.slane %v2574_v2, 1 }
 0x30e   : > { %v2174_v30 = vpop.trf.xlu1 }
 0x30f   : > { %v2175_v33 = vunpack.i.l.bf16 %v2174_v30  ;;  %v2178_v34 = vunpack.i.h.bf16 %v2174_v30 }
 0x316   : > { %v2179_v32 = vpop.trf.xlu1 }
 0x317   : > { %v2180_v35 = vunpack.i.l.bf16 %v2179_v32  ;;  %v2183_v36 = vunpack.i.h.bf16 %v2179_v32  ;;  %v1030_v32 = vadd.f32 %v1029_v24, %v999_v29 }
 0x319   : > { %v1076_v38 = vpack.c.bf16 %v2180_v35, %v2175_v33  ;;  %v1181_v39 = vpack.c.bf16 %v2183_v36, %v2178_v34  ;;  %v1031_v33 = vpop.f32.mrf.mxu1 }
 0x31a   : > { %v1032_v36 = vadd.f32 %v1031_v33, %v999_v29 }
 0x31b   : > { %1088 = vmatpush.bf16.msra.mxu3 %v1076_v38  ;;  %1195 = vmatpush.bf16.msra.mxu2 %v1181_v39 }
 0x31c   : > { %v1125_v39 = vpack.c.bf16 %v1032_v36, %v1030_v32 }
 0x31e   : > { %2075 = vmatmul.msk.bf16.vlgmr.msra.gmra.mxu3 %vm1077_vm9, %v1075_v8  ;;  %2077 = vmatmul.msk.bf16.vlgmr.msra.gmra.mxu2 %vm1077_vm9, %v1184_v9 }
 0x31f   : > { %1406 = vmatpush.bf16.msrb.mxu2 %v1393_v37  ;;  %1136 = vmatpush.bf16.msrb.mxu3 %v1125_v39 }
 0x32e   : > { %2081 = vmatmul.msk.bf16.vlgmr.msrb.gmra.mxu2 %vm1077_vm9, %v1395_v28 }
 0x375   : > { %v1303_v52 = vpop.f32.mrf.mxu0 }
 0x376   : > { %v1308_v13 = vmul.f32 0.25, %v1303_v52 }
 0x378   : > { %v1310_v17 = vadd.f32 %v2204_v57, %v1308_v13 }
 0x37a   : > { %v1312_v21 = vsel %vm1077_vm9, %v1310_v17, -inf }
 0x37d   : > { %v1305_v58 = vpop.f32.mrf.mxu0 }
 0x37e   : > { %v1309_v61 = vmul.f32 0.25, %v1305_v58 }
 0x380   : > { %v1311_v6 = vadd.f32 %v2204_v57, %v1309_v61 }
 0x382   : > { %v1315_v9 = vsel %vm1077_vm9, %v1311_v6, -inf }
 0x3a1   : > { %v1090_v53 = vpop.f32.mrf.mxu3  ;;  %v1197_v54 = vpop.f32.mrf.mxu2 }
 0x3a2   : > { %v1095_v55 = vmul.f32 0.25, %v1090_v53  ;;  %v1202_v56 = vmul.f32 0.25, %v1197_v54 }
 0x3a4   : > { %v1204_v59 = vadd.f32 %v2204_v57, %v1202_v56  ;;  %v1100_v60 = vadd.f32 %v2204_v57, %v1095_v55 }
 0x3a6   : > { %v1206_v1 = vsel %vm1077_vm9, %v1204_v59, -inf  ;;  %v1102_v3 = vsel %vm1077_vm9, %v1100_v60, -inf }
 0x3a7   : > { %1207 = vmax.xlane.f32.xlu2 %v1206_v1  ;;  %1103 = vmax.xlane.f32.xlu0 %v1102_v3 }
 0x3a9   : > { %v1092_v0 = vpop.f32.mrf.mxu3  ;;  %v1199_v4 = vpop.f32.mrf.mxu2 }
 0x3aa   : > { %v1096_v5 = vmul.f32 0.25, %v1092_v0  ;;  %v1203_v8 = vmul.f32 0.25, %v1199_v4 }
 0x3ac   : > { %v1101_v7 = vadd.f32 %v2204_v57, %v1096_v5  ;;  %v1205_v12 = vadd.f32 %v2204_v57, %v1203_v8 }
 0x3ae   : > { %v1105_v10 = vsel %vm1077_vm9, %v1101_v7, -inf  ;;  %v1209_v14 = vsel %vm1077_vm9, %v1205_v12, -inf }
 0x3af   : > { %1316 = vmax.xlane.f32.xlu2 %v1315_v9  ;;  %1106 = vmax.xlane.f32.xlu1 %v1105_v10 }
 0x3b1   : > { %v1408_v11 = vpop.f32.mrf.mxu2 }
 0x3b2   : > { %v1413_v19 = vmul.f32 0.25, %v1408_v11 }
 0x3b4   : > { %v1415_v22 = vadd.f32 %v2204_v57, %v1413_v19 }
 0x3b6   : > { %v1417_v23 = vsel %vm1077_vm9, %v1415_v22, -inf }
 0x3b7   : > { %1210 = vmax.xlane.f32.xlu1 %v1209_v14 }
 0x3b9   : > { %v1410_v15 = vpop.f32.mrf.mxu2 }
 0x3ba   : > { %v1414_v16 = vmul.f32 0.25, %v1410_v15 }
 0x3bc   : > { %v1416_v18 = vadd.f32 %v2204_v57, %v1414_v16 }
 0x3be   : > { %v1420_v20 = vsel %vm1077_vm9, %v1416_v18, -inf }
 0x3bf   : > { %1421 = vmax.xlane.f32.xlu0 %v1420_v20  ;;  %1313 = vmax.xlane.f32.xlu1 %v1312_v21 }
 0x3c7   : > { %1418 = vmax.xlane.f32.xlu1 %v1417_v23 }
 0x41a   : > { %v1208_v25 = vpop.xlane.xlu2 %1207  ;;  %v1104_v26 = vpop.xlane.xlu0 %1103 }
 0x41b   : > { %v1212_v27 = vsub.f32 %v1204_v59, %v1208_v25  ;;  %v1108_v28 = vsub.f32 %v1100_v60, %v1104_v26 }
 0x41d   : > { %v1214_v30 = vmul.f32 1.442695, %v1212_v27  ;;  %v1110_v31 = vmul.f32 1.442695, %v1108_v28 }
 0x41f   : > { %2212 = vpow2.f32 %v1214_v30 }
 0x420   : > { %2214 = vpow2.f32 %v1110_v31 }
 0x422   : > { %v1317_v34 = vpop.xlane.xlu2 %1316  ;;  %v1107_v35 = vpop.xlane.xlu1 %1106 }
 0x423   : > { %v1319_v37 = vsub.f32 %v1311_v6, %v1317_v34  ;;  %v1109_v38 = vsub.f32 %v1101_v7, %v1107_v35 }
 0x425   : > { %v2611_v40 = vpop.eup %2212  ;;  %v1322_v41 = vmul.f32 1.442695, %v1319_v37  ;;  %v1112_v42 = vmul.f32 1.442695, %v1109_v38 }
 0x426   : > { %v2215_v43 = vpop.eup %2214  ;;  %v1218_v2 = vsel %vm1077_vm9, %v2611_v40, 0.0 }
 0x427   : > { %2216 = vpow2.f32 %v1322_v41  ;;  %1219 = vadd.xlane.f32.xlu2 %v1218_v2  ;;  %v1114_v44 = vsel %vm1077_vm9, %v2215_v43, 0.0 }
 0x428   : > { %2218 = vpow2.f32 %v1112_v42  ;;  %1115 = vadd.xlane.f32.xlu0 %v1114_v44 }
 0x42a   : > { %v1211_v45 = vpop.xlane.xlu1 %1210 }
 0x42b   : > { %v1213_v46 = vsub.f32 %v1205_v12, %v1211_v45 }
 0x42d   : > { %v2616_v47 = vpop.eup %2216  ;;  %v1216_v48 = vmul.f32 1.442695, %v1213_v46 }
 0x42e   : > { %v2219_v49 = vpop.eup %2218  ;;  %v1327_v50 = vsel %vm1077_vm9, %v2616_v47, 0.0 }
 0x42f   : > { %2220 = vpow2.f32 %v1216_v48  ;;  %v1117_v51 = vsel %vm1077_vm9, %v2219_v49, 0.0 }
 0x430   : > { %1328 = vadd.xlane.f32.xlu0 %v1327_v50  ;;  %1118 = vadd.xlane.f32.xlu1 %v1117_v51  ;;  %v1499_v50 = vld [vmem:[%s2502_s30 + $0x38] sm:$0xff] }
 0x432   : > { %v1422_v52 = vpop.xlane.xlu0 %1421  ;;  %v1314_v53 = vpop.xlane.xlu1 %1313 }
 0x433   : > { %v1424_v54 = vsub.f32 %v1416_v18, %v1422_v52  ;;  %v1318_v55 = vsub.f32 %v1310_v17, %v1314_v53  ;;  %v1496_v52 = vld [vmem:[%s2502_s30 + $0x20] sm:$0xff]  ;;  %v1497_v53 = vld [vmem:[%s2502_s30 + $0x28] sm:$0xff] }
 0x435   : > { %v2221_v56 = vpop.eup %2220  ;;  %v1427_v57 = vmul.f32 1.442695, %v1424_v54  ;;  %v1320_v58 = vmul.f32 1.442695, %v1318_v55  ;;  %v1503_v54 = vpack.c.bf16 %v1497_v53, %v1496_v52  ;;  %v1494_v55 = vld [vmem:[%s2502_s30 + $0x10] sm:$0xff] }
 0x436   : > { %v1221_v59 = vsel %vm1077_vm9, %v2221_v56, 0.0 }
 0x437   : > { %2222 = vpow2.f32 %v1427_v57 }
 0x438   : > { %2224 = vpow2.f32 %v1320_v58  ;;  %1222 = vadd.xlane.f32.xlu0 %v1221_v59  ;;  %v1492_v58 = vld [vmem:[%s2502_s30] sm:$0xff]  ;;  %v1493_v59 = vld [vmem:[%s2502_s30 + $0x8] sm:$0xff] }
 0x43a   : > { %v1419_v60 = vpop.xlane.xlu1 %1418 }
 0x43b   : > { %v1423_v61 = vsub.f32 %v1415_v22, %v1419_v60  ;;  %v1501_v60 = vpack.c.bf16 %v1493_v59, %v1492_v58 }
 0x43d   : > { %v2223_v1 = vpop.eup %2222  ;;  %v1425_v3 = vmul.f32 1.442695, %v1423_v61 }
 0x43e   : > { %v2225_v0 = vpop.eup %2224  ;;  %v1432_v4 = vsel %vm1077_vm9, %v2223_v1, 0.0 }
 0x43f   : > { %2226 = vpow2.f32 %v1425_v3  ;;  %v1324_v5 = vsel %vm1077_vm9, %v2225_v0, 0.0 }
 0x440   : > { %1433 = vadd.xlane.f32.xlu0 %v1432_v4  ;;  %1325 = vadd.xlane.f32.xlu2 %v1324_v5 }
 0x445   : > { %v2227_v6 = vpop.eup %2226 }
 0x446   : > { %v1429_v7 = vsel %vm1077_vm9, %v2227_v6, 0.0 }
 0x448   : > { %1430 = vadd.xlane.f32.xlu2 %v1429_v7 }
 0x449   : > { %1230 = vrot.lane.b32.xlu1 %v1125_v39, %s2309_s21 }
 0x454   : > { %1335 = vrot.lane.b32.xlu0 %v1125_v39, %s2313_s2 }
 0x460   : > { %1440 = vrot.lane.b32.xlu2 %v1125_v39, %s2312_s18 }
 0x49a   : > { %v1220_v13 = vpop.xlane.xlu2 %1219 }
 0x49b   : > { %v1116_v8 = vpop.xlane.xlu0 %1115 }
 0x49c   : > { %2228 = vrcp.f32 %v1116_v8 }
 0x4a2   : > { %v2229_v11 = vpop.eup %2228 }
 0x4a3   : > { %v1119_v9 = vpop.xlane.xlu1 %1118  ;;  %v1329_v10 = vpop.xlane.xlu0 %1328  ;;  %v1122_v14 = vmul.f32 %v2229_v11, %v2215_v43 }
 0x4a4   : > { %2230 = vrcp.f32 %v1119_v9 }
 0x4aa   : > { %v2231_v12 = vpop.eup %2230 }
 0x4ab   : > { %v1123_v15 = vmul.f32 %v2231_v12, %v2219_v49  ;;  %v1223_v16 = vpop.xlane.xlu0 %1222  ;;  %v1498_v49 = vld [vmem:[%s2502_s30 + $0x30] sm:$0xff] }
 0x4ac   : > { %2232 = vrcp.f32 %v1223_v16  ;;  %v1504_v51 = vpack.c.bf16 %v1499_v50, %v1498_v49  ;;  %v2205_v16 = vld [vmem:[%s2847_s12] ss:$0 sm:$0xff] }
 0x4ad   : > { %v1124_v17 = vpack.c.bf16 %v1123_v15, %v1122_v14  ;;  %2234 = vrcp.f32 %v1220_v13  ;;  %v1591_v50 = vld [vmem:[%s2515_s6] sm:$0xff] }
 0x4ae   : > { %1516 = vmatpush.bf16.msra.mxu0 %v1504_v51  ;;  %v1592_v51 = vld [vmem:[%s2515_s6 + $0x8] sm:$0xff] }
 0x4af   : > { %2076 = vmatmul.msk.bf16.vlgmr.msrb.gmra.mxu3 %vm1077_vm9, %v1124_v17  ;;  %v1600_v53 = vpack.c.bf16 %v1592_v51, %v1591_v50 }
 0x4b2   : > { %v2233_v19 = vpop.eup %2232  ;;  %1517 = vmatpush.bf16.msra.mxu0 %v1503_v54 }
 0x4b3   : > { %v1326_v18 = vpop.xlane.xlu2 %1325  ;;  %v2235_v20 = vpop.eup %2234  ;;  %v1227_v21 = vmul.f32 %v2233_v19, %v2221_v56  ;;  %v1495_v56 = vld [vmem:[%s2502_s30 + $0x18] sm:$0xff] }
 0x4b4   : > { %2236 = vrcp.f32 %v1326_v18  ;;  %v1226_v24 = vmul.f32 %v2235_v20, %v2611_v40  ;;  %v1434_v26 = vpop.xlane.xlu0 %1433  ;;  %v1502_v57 = vpack.c.bf16 %v1495_v56, %v1494_v55 }
 0x4b5   : > { %2238 = vrcp.f32 %v1329_v10 }
 0x4b6   : > { %v1228_v25 = vpack.c.bf16 %v1227_v21, %v1226_v24  ;;  %1518 = vmatpush.bf16.msra.mxu0 %v1502_v57 }
 0x4ba   : > { %v2237_v27 = vpop.eup %2236  ;;  %1519 = vmatpush.bf16.msra.mxu0 %v1501_v60 }
 0x4bb   : > { %v1431_v22 = vpop.xlane.xlu2 %1430  ;;  %v1231_v23 = vpop.permute.xlu1 %1230  ;;  %v1332_v30 = vmul.f32 %v2237_v27, %v2225_v0 }
 0x4bc   : > { %1243 = vmatpush.bf16.msra.mxu3 %v1231_v23  ;;  %2240 = vrcp.f32 %v1431_v22  ;;  %v2239_v28 = vpop.eup %2238 }
 0x4bd   : > { %2242 = vrcp.f32 %v1434_v26  ;;  %v1333_v31 = vmul.f32 %v2239_v28, %v2616_v47 }
 0x4bf   : > { %2078 = vmatmul.msk.bf16.vlgmr.msra.gmra.mxu3 %vm1077_vm9, %v1228_v25  ;;  %v1334_v34 = vpack.c.bf16 %v1333_v31, %v1332_v30  ;;  %v2314_v25 = vmov 64.0  }
 0x4c0   : > { %2244 = vrcp.f32 %v2314_v25  ;;  %v1653_v25 = vld [vmem:[%s2524_s7 + $0x50] sm:$0xff] }
 0x4c2   : > { %v2241_v33 = vpop.eup %2240 }
 0x4c3   : > { %v1441_v29 = vpop.permute.xlu2 %1440  ;;  %v2243_v35 = vpop.eup %2242  ;;  %v1437_v36 = vmul.f32 %v2241_v33, %v2227_v6 }
 0x4c4   : > { %1453 = vmatpush.bf16.msrb.mxu3 %v1441_v29  ;;  %v1438_v37 = vmul.f32 %v2243_v35, %v2223_v1 }
 0x4c6   : > { %v1336_v32 = vpop.permute.xlu0 %1335  ;;  %v1439_v38 = vpack.c.bf16 %v1438_v37, %v1437_v36  ;;  %v2245_v26 = vpop.eup %2244 }
 0x4c7   : > { %1348 = vmatpush.bf16.msrb.mxu1 %v1336_v32  ;;  %v1537_v27 = vmul.f32 64.0, %v2245_v26  ;;  %vm1541_vm12 = vweird.f32 %v2245_v26 }
 0x4c9   : > { %v1538_v28 = vsub.f32 1.0, %v1537_v27 }
 0x4ca   : > { %2080 = vmatmul.msk.bf16.vlgmr.msrb.gmra.mxu1 %vm1077_vm9, %v1334_v34 }
 0x4cb   : > { %v1539_v29 = vmul.f32 %v2245_v26, %v1538_v28  ;;  %v1651_v28 = vld [vmem:[%s2524_s7 + $0x40] sm:$0xff] }
 0x4cd   : > { %v1540_v30 = vadd.f32 %v2245_v26, %v1539_v29  ;;  %v1652_v29 = vld [vmem:[%s2524_s7 + $0x48] sm:$0xff] }
 0x4cf   : > { %2082 = vmatmul.msk.bf16.vlgmr.msrb.gmra.mxu3 %vm1077_vm9, %v1439_v38 }
 0x532   : > { %v1138_v39 = vpop.f32.mrf.mxu3 }
 0x53a   : > { %v1140_v40 = vpop.f32.mrf.mxu3 }
 0x542   : > { %v1245_v41 = vpop.f32.mrf.mxu3 }
 0x547   : > { %v1350_v42 = vpop.f32.mrf.mxu1 }
 0x54a   : > { %v1247_v43 = vpop.f32.mrf.mxu3 }
 0x54b   : > { %v2194_v46 = vpack.i.bf16 %v1247_v43, %v1245_v41  ;;  %v1598_v41 = vld [vmem:[%s2515_s6 + $0x38] sm:$0xff]  ;;  %v1595_v43 = vld [vmem:[%s2515_s6 + $0x20] sm:$0xff] }
 0x54f   : > { %v1352_v2 = vpop.f32.mrf.mxu1 }
 0x550   : > { %v2189_v44 = vpack.i.bf16 %v1352_v2, %v1350_v42  ;;  %v1596_v2 = vld [vmem:[%s2515_s6 + $0x28] sm:$0xff] }
 0x552   : > { %2190 = vrot.lane.b32.xlu1 %v2189_v44, %s2311_s24  ;;  %v1455_v45 = vpop.f32.mrf.mxu3  ;;  %v1602_v44 = vpack.c.bf16 %v1596_v2, %v1595_v43  ;;  %s2851_s24 = sld [smem:[#allocation21_spill]] }
 0x558   : > { %s2852_s18 = scalar_lea.vmem %s2851_s24, %s2467_s4 }
 0x55a   : > { %2195 = vrot.lane.b32.xlu1 %v2194_v46, %s2307_s16  ;;  %v1457_v47 = vpop.f32.mrf.mxu3  ;;  %v1594_v46 = vld [vmem:[%s2515_s6 + $0x18] sm:$0xff]  ;;  %s2849_s16 = sld [smem:[#allocation19_spill]] }
 0x55b   : > { %v2199_v48 = vpack.i.bf16 %v1457_v47, %v1455_v45  ;;  %v1593_v45 = vld [vmem:[%s2515_s6 + $0x10] sm:$0xff] }
 0x55c   : > { %v1601_v47 = vpack.c.bf16 %v1594_v46, %v1593_v45 }
 0x560   : > { %s2850_s29 = scalar_lea.vmem %s2849_s16, %s2467_s4 }
 0x562   : > { %2200 = vrot.lane.b32.xlu1 %v2199_v48, %s2310_s26 }
 0x5c4   : > { %v2191_v61 = vpop.permute.xlu1 %2190 }
 0x5c5   : > { %v2193_v6 = vunpack.i.h.bf16 %v2191_v61  ;;  %v2192_v7 = vunpack.i.l.bf16 %v2191_v61 }
 0x5cc   : > { %v2196_v1 = vpop.permute.xlu1 %2195 }
 0x5cd   : > { %v2198_v3 = vunpack.i.h.bf16 %v2196_v1  ;;  %v2197_v0 = vunpack.i.l.bf16 %v2196_v1 }
 0x5cf   : > { %v1485_v4 = vsel %vm1077_vm9, %v1140_v40, %v2198_v3  ;;  %v1484_v5 = vsel %vm1077_vm9, %v1138_v39, %v2197_v0  ;;  %v1597_v40 = vld [vmem:[%s2515_s6 + $0x30] sm:$0xff] }
 0x5d0   : > { %v1487_v11 = vsel %vm1486_vm10, %v1484_v5, %v2192_v7  ;;  %v1488_v12 = vsel %vm1486_vm10, %v1485_v4, %v2193_v6  ;;  %v1603_v42 = vpack.c.bf16 %v1598_v41, %v1597_v40  ;;  %v1643_v40 = vld [vmem:[%s2524_s7] sm:$0xff]  ;;  %v1644_v41 = vld [vmem:[%s2524_s7 + $0x8] sm:$0xff] }
 0x5d1   : > { %v1660_v43 = vpack.c.bf16 %v1644_v41, %v1643_v40 }
 0x5d2   : > { %1615 = vmatpush.bf16.msra.mxu1 %v1603_v42 }
 0x5d4   : > { %v2201_v8 = vpop.permute.xlu1 %2200 }
 0x5d5   : > { %v2203_v9 = vunpack.i.h.bf16 %v2201_v8  ;;  %v2202_v10 = vunpack.i.l.bf16 %v2201_v8  ;;  %v2206_v8 = vld [vmem:[%s2848_s0] ss:$0 sm:$0xff] }
 0x5d6   : > { %1616 = vmatpush.bf16.msra.mxu1 %v1602_v44 }
 0x5d7   : > { %v1490_v13 = vsel %vm1489_vm11, %v1487_v11, %v2202_v10  ;;  %v1491_v14 = vsel %vm1489_vm11, %v1488_v12, %v2203_v9  ;;  %v2207_v12 = vld [vmem:[%s2850_s29] ss:$0 sm:$0xff] }
 0x5d8   : > { %v1500_v15 = vpack.c.bf16 %v1491_v14, %v1490_v13 }
 0x5da   : > { %2083 = vmatmul.msk.bf16.vlgmr.msra.gmra.mxu0 %vm1002_vm8, %v1500_v15  ;;  %1617 = vmatpush.bf16.msra.mxu1 %v1601_v47 }
 0x5de   : > { %1618 = vmatpush.bf16.msra.mxu1 %v1600_v53 }
 0x657   : > { %v1521_v17 = vpop.f32.mrf.mxu0 }
 0x658   : > { %v1522_v18 = vadd.f32 %v2205_v16, %v1521_v17 }
 0x65a   : > { %v1526_v19 = vadd.f32 %v1522_v18, %v2563_v62  ;;  %v2657_v62 = vsel %vm1541_vm12, %v2245_v26, %v1540_v30  ;;  %v1654_v26 = vld [vmem:[%s2524_s7 + $0x58] sm:$0xff]  ;;  %v1664_v30 = vpack.c.bf16 %v1652_v29, %v1651_v28 }
 0x65b   : > { %v1665_v27 = vpack.c.bf16 %v1654_v26, %v1653_v25 }
 0x65c   : > { %v1530_v20 = vsel %vm1002_vm8, %v1526_v19, 0.0 }
 0x65d   : > { %1531 = vadd.xlane.f32.xlu0 %v1530_v20  ;;  %v1658_v20 = vld [vmem:[%s2524_s7 + $0x78] sm:$0xff] }
 0x65f   : > { %v1523_v21 = vpop.f32.mrf.mxu0 }
 0x660   : > { %v1524_v22 = vadd.f32 %v2205_v16, %v1523_v21 }
 0x662   : > { %v1527_v23 = vadd.f32 %v1524_v22, %v2565_v63  ;;  %v1655_v22 = vld [vmem:[%s2524_s7 + $0x60] sm:$0xff] }
 0x664   : > { %v1533_v24 = vsel %vm1002_vm8, %v1527_v23, 0.0 }
 0x665   : > { %1534 = vadd.xlane.f32.xlu2 %v1533_v24 }
 0x6d0   : > { %v1532_v31 = vpop.xlane.xlu0 %1531 }
 0x6d1   : > { %v1543_v32 = vmul.f32 %v2657_v62, %v1532_v31  ;;  %v1649_v31 = vld [vmem:[%s2524_s7 + $0x30] sm:$0xff] }
 0x6d3   : > { %v1545_v63 = vsub.f32 %v1526_v19, %v1543_v32  ;;  %v1657_v19 = vld [vmem:[%s2524_s7 + $0x70] sm:$0xff]  ;;  %v1650_v32 = vld [vmem:[%s2524_s7 + $0x38] sm:$0xff] }
 0x6d4   : > { %v1667_v21 = vpack.c.bf16 %v1658_v20, %v1657_v19 }
 0x6d5   : > { %v1547_v33 = vmul.f32 %v1545_v63, %v1545_v63 }
 0x6d6   : > { %1672 = vmatpush.bf16.msra.mxu2 %v1667_v21 }
 0x6d7   : > { %v1549_v34 = vsel %vm1002_vm8, %v1547_v33, 0.0  ;;  %v1647_v33 = vld [vmem:[%s2524_s7 + $0x20] sm:$0xff] }
 0x6d8   : > { %v1535_v35 = vpop.xlane.xlu2 %1534  ;;  %1550 = vadd.xlane.f32.xlu1 %v1549_v34  ;;  %v1648_v34 = vld [vmem:[%s2524_s7 + $0x28] sm:$0xff] }
 0x6d9   : > { %v1544_v36 = vmul.f32 %v2657_v62, %v1535_v35  ;;  %v1662_v35 = vpack.c.bf16 %v1648_v34, %v1647_v33 }
 0x6db   : > { %v1546_v37 = vsub.f32 %v1527_v23, %v1544_v36  ;;  %v1656_v23 = vld [vmem:[%s2524_s7 + $0x68] sm:$0xff]  ;;  %v1645_v36 = vld [vmem:[%s2524_s7 + $0x10] sm:$0xff] }
 0x6dc   : > { %v1666_v24 = vpack.c.bf16 %v1656_v23, %v1655_v22 }
 0x6dd   : > { %v1548_v38 = vmul.f32 %v1546_v37, %v1546_v37 }
 0x6de   : > { %1673 = vmatpush.bf16.msra.mxu2 %v1666_v24 }
 0x6df   : > { %v1552_v39 = vsel %vm1002_vm8, %v1548_v38, 0.0 }
 0x6e0   : > { %1553 = vadd.xlane.f32.xlu2 %v1552_v39  ;;  %v2208_v39 = vld [vmem:[%s2852_s18] ss:$0 sm:$0xff] }
 0x6e2   : > { %1674 = vmatpush.bf16.msra.mxu2 %v1665_v27 }
 0x6e6   : > { %1675 = vmatpush.bf16.msra.mxu2 %v1664_v30 }
 0x74b   : > { %v1551_v48 = vpop.xlane.xlu1 %1550 }
 0x74c   : > { %v1555_v49 = vmul.f32 %v1551_v48, %v2657_v62 }
 0x74e   : > { %v1557_v52 = vadd.f32 1e-05, %v1555_v49 }
 0x750   : > { %2246 = vrsqrt.f32 %v1557_v52  ;;  %vm1565_vm14 = vweird.f32 %v1557_v52 }
 0x753   : > { %v1554_v54 = vpop.xlane.xlu2 %1553 }
 0x754   : > { %v1556_v55 = vmul.f32 %v1554_v54, %v2657_v62 }
 0x756   : > { %v2247_v56 = vpop.eup %2246  ;;  %v1558_v57 = vadd.f32 1e-05, %v1556_v55 }
 0x757   : > { %v1560_v58 = vmul.f32 %v2247_v56, %v1557_v52  ;;  %vm1566_vm13 = vweird.f32 %v2247_v56 }
 0x758   : > { %2248 = vrsqrt.f32 %v1558_v57  ;;  %vm1567_vm15 = vmor %vm1565_vm14, %vm1566_vm13  ;;  %vm1575_vm1 = vweird.f32 %v1558_v57 }
 0x759   : > { %v1561_v59 = vmul.f32 %v2247_v56, %v1560_v58 }
 0x75b   : > { %v1562_v60 = vmul.f32 0.5, %v1561_v59 }
 0x75d   : > { %v1563_v61 = vsub.f32 1.5, %v1562_v60 }
 0x75e   : > { %v2249_v1 = vpop.eup %2248 }
 0x75f   : > { %v1564_v3 = vmul.f32 %v2247_v56, %v1563_v61  ;;  %v1570_v0 = vmul.f32 %v2249_v1, %v1558_v57  ;;  %vm1576_vm0 = vweird.f32 %v2249_v1 }
 0x760   : > { %vm1577_vm2 = vmor %vm1575_vm1, %vm1576_vm0 }
 0x761   : > { %v1571_v4 = vmul.f32 %v2249_v1, %v1570_v0  ;;  %v1568_v5 = vsel %vm1567_vm15, %v2247_v56, %v1564_v3 }
 0x762   : > { %v1579_v9 = vmul.f32 %v1568_v5, %v1545_v63  ;;  %v1663_v63 = vpack.c.bf16 %v1650_v32, %v1649_v31 }
 0x763   : > { %v1572_v6 = vmul.f32 0.5, %v1571_v4  ;;  %v2209_v4 = vld [vmem:[%s886_s17] ss:$0 sm:$0xff] }
 0x764   : > { %v1584_v13 = vmul.f32 %v2206_v8, %v1579_v9  ;;  %1676 = vmatpush.bf16.msra.mxu2 %v1663_v63 }
 0x765   : > { %v1573_v7 = vsub.f32 1.5, %v1572_v6 }
 0x766   : > { %v2683_v16 = vadd.f32 %v2207_v12, %v1584_v13 }
 0x767   : > { %v1574_v10 = vmul.f32 %v2249_v1, %v1573_v7 }
 0x768   : > { %1677 = vmatpush.bf16.msra.mxu2 %v1662_v35 }
 0x769   : > { %v1578_v11 = vsel %vm1577_vm2, %v2249_v1, %v1574_v10 }
 0x76a   : > { %v1580_v14 = vmul.f32 %v1578_v11, %v1546_v37  ;;  %v1646_v37 = vld [vmem:[%s2524_s7 + $0x18] sm:$0xff] }
 0x76b   : > { %v1661_v38 = vpack.c.bf16 %v1646_v37, %v1645_v36  ;;  %v2210_v36 = vld [vmem:[%s889_s22] ss:$0 sm:$0xff] }
 0x76c   : > { %v1585_v15 = vmul.f32 %v2206_v8, %v1580_v14 }
 0x76d   : > { %1678 = vmatpush.bf16.msra.mxu2 %v1661_v38  ;;  %v2211_v38 = vld [vmem:[%s892_s11] ss:$0 sm:$0xff]  ;;  %s2854_s11 = sld [smem:[#allocation4_spill]] }
 0x76e   : > { %v2685_v17 = vadd.f32 %v2207_v12, %v1585_v15 }
 0x770   : > { %v1599_v18 = vpack.c.bf16 %v2685_v17, %v2683_v16 }
 0x771   : > { %1679 = vmatpush.bf16.msra.mxu2 %v1660_v43 }
 0x772   : > { %2084 = vmatmul.msk.bf16.vlgmr.msra.gmra.mxu1 %vm1002_vm8, %v1599_v18 }
 0x773   : > { %p2085_p8 = scmp.ne.s32.totalorder %s2854_s11, 1 }
 0x774   : > { %s2855_s4 = sld [smem:[#allocation10_spill]] (!%p2085_p8)  ;;  %s2316_s22 = smov (!%p2085_p8), 64  }
 0x775   : > { %s2856_s12 = sld [smem:[#allocation23_spill]] (!%p2085_p8) }
 0x776   : > { %s2857_s0 = sld [smem:[#allocation24_spill]] (!%p2085_p8) }
 0x777   : > { %s2858_s16 = sld [smem:[#allocation25_spill]] (!%p2085_p8) }
 0x7ef   : > { %v1620_v42 = vpop.f32.mrf.mxu1 }
 0x7f0   : > { %v1621_v2 = vadd.f32 %v2208_v39, %v1620_v42 }
 0x7f2   : > { %v1625_v44 = vmul.f32 %v1621_v2, %v1621_v2 }
 0x7f4   : > { %v1627_v45 = vmul.f32 %v1625_v44, %v1621_v2 }
 0x7f6   : > { %v1629_v46 = vmul.f32 0.044715, %v1627_v45 }
 0x7f7   : > { %v1622_v47 = vpop.f32.mrf.mxu1 }
 0x7f8   : > { %v1631_v48 = vadd.f32 %v1629_v46, %v1621_v2  ;;  %v1623_v49 = vadd.f32 %v2208_v39, %v1622_v47 }
 0x7fa   : > { %v1633_v50 = vmul.f32 0.7978846, %v1631_v48  ;;  %v1626_v51 = vmul.f32 %v1623_v49, %v1623_v49 }
 0x7fc   : > { %v1628_v52 = vmul.f32 %v1626_v51, %v1623_v49  ;;  %2250 = vtanh.f32 %v1633_v50 }
 0x7fe   : > { %v1630_v53 = vmul.f32 0.044715, %v1628_v52 }
 0x800   : > { %v1632_v54 = vadd.f32 %v1630_v53, %v1623_v49 }
 0x802   : > { %v1634_v55 = vmul.f32 0.7978846, %v1632_v54  ;;  %v2251_v56 = vpop.eup %2250 }
 0x803   : > { %v1637_v57 = vadd.f32 1.0, %v2251_v56 }
 0x804   : > { %2252 = vtanh.f32 %v1634_v55 }
 0x805   : > { %v1639_v59 = vmul.f32 0.5, %v1637_v57 }
 0x807   : > { %v1641_v1 = vmul.f32 %v1639_v59, %v1621_v2 }
 0x80a   : > { %v2253_v58 = vpop.eup %2252 }
 0x80b   : > { %v1638_v60 = vadd.f32 1.0, %v2253_v58 }
 0x80d   : > { %v1640_v61 = vmul.f32 0.5, %v1638_v60 }
 0x80f   : > { %v1642_v3 = vmul.f32 %v1640_v61, %v1623_v49 }
 0x811   : > { %v1659_v0 = vpack.c.bf16 %v1642_v3, %v1641_v1 }
 0x813   : > { %1680 = vmatmul.bf16.vlgmr.msra.gmra.mxu2 %v1659_v0 }
 0x896   : > { %v1681_v5 = vpop.f32.mrf.mxu2 }
 0x897   : > { %v1682_v6 = vadd.f32 %v2209_v4, %v1681_v5 }
 0x899   : > { %v1686_v7 = vadd.f32 %v1682_v6, %v2683_v16 }
 0x89b   : > { %v1690_v8 = vsel %vm1002_vm8, %v1686_v7, 0.0 }
 0x89c   : > { %1691 = vadd.xlane.f32.xlu0 %v1690_v8 }
 0x89e   : > { %v1683_v9 = vpop.f32.mrf.mxu2 }
 0x89f   : > { %v1684_v10 = vadd.f32 %v2209_v4, %v1683_v9 }
 0x8a1   : > { %v1687_v11 = vadd.f32 %v1684_v10, %v2685_v17 }
 0x8a3   : > { %v1693_v12 = vsel %vm1002_vm8, %v1687_v11, 0.0 }
 0x8a4   : > { %1694 = vadd.xlane.f32.xlu1 %v1693_v12 }
 0x90f   : > { %v1692_v13 = vpop.xlane.xlu0 %1691 }
 0x910   : > { %v1696_v14 = vmul.f32 %v1692_v13, %v2657_v62 }
 0x912   : > { %v1698_v15 = vsub.f32 %v1686_v7, %v1696_v14 }
 0x914   : > { %v1700_v18 = vmul.f32 %v1698_v15, %v1698_v15 }
 0x916   : > { %v1702_v19 = vsel %vm1002_vm8, %v1700_v18, 0.0 }
 0x917   : > { %v1695_v20 = vpop.xlane.xlu1 %1694  ;;  %1703 = vadd.xlane.f32.xlu2 %v1702_v19 }
 0x918   : > { %v1697_v16 = vmul.f32 %v1695_v20, %v2657_v62 }
 0x91a   : > { %v1699_v21 = vsub.f32 %v1687_v11, %v1697_v16 }
 0x91c   : > { %v1701_v22 = vmul.f32 %v1699_v21, %v1699_v21 }
 0x91e   : > { %v1705_v23 = vsel %vm1002_vm8, %v1701_v22, 0.0 }
 0x91f   : > { %1706 = vadd.xlane.f32.xlu0 %v1705_v23 }
 0x98a   : > { %v1704_v17 = vpop.xlane.xlu2 %1703 }
 0x98b   : > { %v1708_v24 = vmul.f32 %v1704_v17, %v2657_v62 }
 0x98d   : > { %v1710_v25 = vadd.f32 1e-05, %v1708_v24 }
 0x98f   : > { %2254 = vrsqrt.f32 %v1710_v25  ;;  %vm1718_vm4 = vweird.f32 %v1710_v25 }
 0x992   : > { %v1707_v26 = vpop.xlane.xlu0 %1706 }
 0x993   : > { %v1709_v27 = vmul.f32 %v1707_v26, %v2657_v62 }
 0x995   : > { %v2255_v28 = vpop.eup %2254  ;;  %v1711_v29 = vadd.f32 1e-05, %v1709_v27 }
 0x996   : > { %v1713_v30 = vmul.f32 %v2255_v28, %v1710_v25  ;;  %vm1719_vm3 = vweird.f32 %v2255_v28 }
 0x997   : > { %2256 = vrsqrt.f32 %v1711_v29  ;;  %vm1720_vm5 = vmor %vm1718_vm4, %vm1719_vm3  ;;  %vm1728_vm7 = vweird.f32 %v1711_v29 }
 0x998   : > { %v1714_v31 = vmul.f32 %v2255_v28, %v1713_v30 }
 0x99a   : > { %v1715_v32 = vmul.f32 0.5, %v1714_v31 }
 0x99c   : > { %v1716_v63 = vsub.f32 1.5, %v1715_v32 }
 0x99d   : > { %v2257_v33 = vpop.eup %2256 }
 0x99e   : > { %v1717_v34 = vmul.f32 %v2255_v28, %v1716_v63  ;;  %v1723_v35 = vmul.f32 %v2257_v33, %v1711_v29  ;;  %vm1729_vm6 = vweird.f32 %v2257_v33 }
 0x99f   : > { %vm1730_vm9 = vmor %vm1728_vm7, %vm1729_vm6 }
 0x9a0   : > { %v1721_v62 = vsel %vm1720_vm5, %v2255_v28, %v1717_v34  ;;  %v1724_v37 = vmul.f32 %v2257_v33, %v1723_v35 }
 0x9a1   : > { %v1732_v39 = vmul.f32 %v1721_v62, %v1698_v15 }
 0x9a2   : > { %v1725_v40 = vmul.f32 0.5, %v1724_v37 }
 0x9a3   : > { %v1737_v41 = vmul.f32 %v2210_v36, %v1732_v39 }
 0x9a4   : > { %v1726_v42 = vsub.f32 1.5, %v1725_v40 }
 0x9a5   : > { %v2736_v43 = vadd.f32 %v2211_v38, %v1737_v41 }
 0x9a6   : > { %v1727_v2 = vmul.f32 %v2257_v33, %v1726_v42 }
 0x9a7   : > { %1744 = vst.msk [vmem:[#allocation2] sm:$0xff] %vm1002_vm8, %v2736_v43 }
 0x9a8   : > { %v1731_v44 = vsel %vm1730_vm9, %v2257_v33, %v1727_v2 }
 0x9a9   : > { %v1733_v45 = vmul.f32 %v1731_v44, %v1699_v21 }
 0x9ab   : > { %v1738_v46 = vmul.f32 %v2210_v36, %v1733_v45  ;;  %1749 = sbr.rel (%p2085_p8) target bundleno = 3138 (0xc42), region = 112 }
 0x9ad   : > { %v1743_v47 = vadd.f32 %v2211_v38, %v1738_v46 }
 0x9af   : > { %1745 = vst.msk [vmem:[#allocation2 + $0x8] sm:$0xff] %vm1002_vm8, %v1743_v47 }
 0x9b0   : > { %v1750_v48 = vld [vmem:[%s2855_s4] sm:$0xff]  ;;  %vm1773_vm10 = vcmask 7168   ;;  %v1751_v49 = vld [vmem:[%s2855_s4 + $0x8] sm:$0xff]  ;;  %v2315_v50 = vmov 0   ;;  %vm1811_vm15 = vcmask 1040384   ;;  %v2317_v28 = vmov 128.0  }
 0x9b1   : > { %2258 = vset.pattern.permute.xlu0 %v2315_v50  ;;  %v1774_v51 = vsel %vm1773_vm10, %v1750_v48, 0.0  ;;  %v1775_v52 = vsel %vm1773_vm10, %v1751_v49, 0.0  ;;  %2259 = vset.pattern.permute.xlu1 %v2315_v50  ;;  %vm1850_vm3 = vcmask 0  }
 0x9b2   : > { %1754 = vperm.xlu0 %2258, %v1750_v48   ;;  %v1776_v53 = vadd.f32 %v1775_v52, %v1774_v51  ;;  %v1843_v51 = vld [vmem:[%s2858_s16] sm:$0x1] }
 0x9b4   : > { %v1777_v54 = vrot.slane %v1776_v53, 4 }
 0x9b6   : > { %v1778_v55 = vadd.f32 %v1777_v54, %v1776_v53 }
 0x9b8   : > { %v1779_v56 = vrot.slane %v1778_v55, 2 }
 0x9ba   : > { %1759 = vperm.xlu0 %2258, %v1751_v49   ;;  %v1780_v57 = vadd.f32 %v1779_v56, %v1778_v55  ;;  %v1810_v49 = vld [vmem:[%s2857_s0] sm:$0x1]  ;;  %v1848_v55 = vld [vmem:[#allocation3] sm:$0x1] }
 0x9bc   : > { %v1781_v58 = vrot.slane %v1780_v57, 1 }
 0x9be   : > { %v1782_v59 = vadd.f32 %v1781_v58, %v1780_v57 }
 0x9c0   : > { %v1783_v60 = vmax.f32 %v1782_v59, 1.0 }
 0x9c2   : > { %1786 = vperm.xlu1 %2259, %v1783_v60  }
 0xa24   : > { %v1755_v61 = vpop.permute.xlu0 %1754 }
 0xa25   : > { %v1762_v1 = vmul.f32 %v1755_v61, %v2736_v43 }
 0xa27   : > { %v1764_v0 = vsel %vm1002_vm8, %v1762_v1, 0.0 }
 0xa2c   : > { %v1760_v3 = vpop.permute.xlu0 %1759 }
 0xa2d   : > { %v1763_v4 = vmul.f32 %v1760_v3, %v1743_v47  ;;  %v1809_v47 = vld [vmem:[%s2856_s12] sm:$0x1] }
 0xa2f   : > { %v1765_v5 = vsel %vm1002_vm8, %v1763_v4, 0.0 }
 0xa30   : > { %v1766_v6 = vadd.f32 %v1765_v5, %v1764_v0 }
 0xa32   : > { %v1767_v7 = vrot.slane %v1766_v6, 4 }
 0xa34   : > { %v1768_v8 = vadd.f32 %v1767_v7, %v1766_v6  ;;  %v1787_v9 = vpop.permute.xlu1 %1786 }
 0xa35   : > { %2260 = vrcp.f32 %v1787_v9  ;;  %v1800_v15 = vand.u32 2147483648, %v1787_v9  ;;  %v1798_v20 = vand.u32 2147483647, %v1787_v9  ;;  %vm1794_vm12 = vweird.f32 %v1787_v9 }
 0xa36   : > { %v1769_v10 = vrot.slane %v1768_v8, 2  ;;  %2262 = vrcp.f32 %v2317_v28 }
 0xa37   : > { %v1801_v21 = vor.u32 1.1754944e-38, %v1800_v15  ;;  %vm1799_vm14 = vcmp.eq.f32.partialorder %v1798_v20, 8.507059e+37 }
 0xa38   : > { %v1770_v12 = vadd.f32 %v1769_v10, %v1768_v8 }
 0xa3a   : > { %v1771_v19 = vrot.slane %v1770_v12, 1 }
 0xa3b   : > { %v2261_v11 = vpop.eup %2260 }
 0xa3c   : > { %v1790_v13 = vmul.f32 %v2261_v11, %v1787_v9  ;;  %vm1795_vm11 = vweird.f32 %v2261_v11  ;;  %v1772_v22 = vadd.f32 %v1771_v19, %v1770_v12  ;;  %v2263_v29 = vpop.eup %2262 }
 0xa3d   : > { %vm1796_vm13 = vmor %vm1794_vm12, %vm1795_vm11  ;;  %v1816_v30 = vmul.f32 128.0, %v2263_v29  ;;  %vm1820_vm0 = vweird.f32 %v2263_v29 }
 0xa3e   : > { %v1791_v14 = vsub.f32 1.0, %v1790_v13 }
 0xa3f   : > { %v1817_v31 = vsub.f32 1.0, %v1816_v30 }
 0xa40   : > { %v1792_v18 = vmul.f32 %v2261_v11, %v1791_v14 }
 0xa41   : > { %v1818_v32 = vmul.f32 %v2263_v29, %v1817_v31 }
 0xa42   : > { %v1793_v16 = vadd.f32 %v2261_v11, %v1792_v18 }
 0xa43   : > { %v1819_v63 = vadd.f32 %v2263_v29, %v1818_v32 }
 0xa44   : > { %v1797_v23 = vsel %vm1796_vm13, %v2261_v11, %v1793_v16 }
 0xa45   : > { %v1802_v17 = vsel %vm1799_vm14, %v1801_v21, %v1797_v23  ;;  %v1821_v33 = vsel %vm1820_vm0, %v2263_v29, %v1819_v63 }
 0xa46   : > { %v1803_v24 = vmul.f32 %v1802_v17, %v1772_v22 }
 0xa48   : > { %1805 = vrot.lane.b32.xlu1 %v1803_v24, %s2316_s22 }
 0xaba   : > { %v1806_v25 = vpop.permute.xlu1 %1805 }
 0xabb   : > { %v1808_v26 = vsel %vm1002_vm8, %v2736_v43, %v1806_v25 }
 0xabc   : > { %v1812_v27 = vsel %vm1811_vm15, %v1808_v26, 0.0 }
 0xabd   : > { %1813 = vadd.xlane.f32.xlu2 %v1812_v27 }
 0xb30   : > { %v1814_v34 = vpop.xlane.xlu2 %1813 }
 0xb31   : > { %v1822_v35 = vmul.f32 %v1821_v33, %v1814_v34 }
 0xb33   : > { %v1823_v36 = vsub.f32 %v1808_v26, %v1822_v35 }
 0xb35   : > { %v1824_v62 = vmul.f32 %v1823_v36, %v1823_v36 }
 0xb37   : > { %v1825_v37 = vsel %vm1811_vm15, %v1824_v62, 0.0 }
 0xb38   : > { %1826 = vadd.xlane.f32.xlu2 %v1825_v37 }
 0xbab   : > { %v1827_v38 = vpop.xlane.xlu2 %1826 }
 0xbac   : > { %v1828_v39 = vmul.f32 %v1827_v38, %v1821_v33 }
 0xbae   : > { %v1829_v40 = vadd.f32 1e-05, %v1828_v39 }
 0xbb0   : > { %2264 = vrsqrt.f32 %v1829_v40  ;;  %vm1836_vm1 = vweird.f32 %v1829_v40 }
 0xbb6   : > { %v2265_v41 = vpop.eup %2264 }
 0xbb7   : > { %v1831_v42 = vmul.f32 %v2265_v41, %v1829_v40  ;;  %vm1837_vm8 = vweird.f32 %v2265_v41 }
 0xbb8   : > { %vm1838_vm2 = vmor %vm1836_vm1, %vm1837_vm8 }
 0xbb9   : > { %v1832_v43 = vmul.f32 %v2265_v41, %v1831_v42 }
 0xbbb   : > { %v1833_v2 = vmul.f32 0.5, %v1832_v43 }
 0xbbd   : > { %v1834_v44 = vsub.f32 1.5, %v1833_v2 }
 0xbbf   : > { %v1835_v45 = vmul.f32 %v2265_v41, %v1834_v44 }
 0xbc1   : > { %v1839_v46 = vsel %vm1838_vm2, %v2265_v41, %v1835_v45 }
 0xbc2   : > { %v1840_v48 = vmul.f32 %v1839_v46, %v1823_v36 }
 0xbc4   : > { %v1841_v50 = vmul.f32 %v1840_v48, %v1809_v47 }
 0xbc6   : > { %v1842_v52 = vadd.f32 %v1841_v50, %v1810_v49 }
 0xbc8   : > { %v1844_v53 = vmul.f32 %v1843_v51, %v1842_v52 }
 0xbca   : > { %v1845_v54 = vsel %vm1811_vm15, %v1844_v53, 0.0 }
 0xbcb   : > { %1846 = vadd.xlane.f32.xlu0 %v1845_v54 }
 0xc3e   : > { %v1847_v56 = vpop.xlane.xlu0 %1846 }
 0xc3f   : > { %v1849_v57 = vadd.f32 %v1848_v55, %v1847_v56 }
 0xc41   : > { %1851 = vst.msk [vmem:[%s895_s28] sm:$0x1] %vm1850_vm3, %v1849_v57 }
 0xc42 PF: > { %s2860_s24 = sld [smem:[#allocation7_spill]] }
 0xc43   : > { %s2861_s26 = sld [smem:[#allocation5_spill]] }
 0xc44   : > { %s2862_s27 = sld [smem:[#allocation6_spill]] }
 0xc45   : > { %s2863_s3 = sld [smem:[#allocation8_spill]] }
 0xc46   : > { %s2864_s28 = sld [smem:[#allocation9_spill]] }
 0xc48   : > { %s33_s29 = sadd.s32 1, %s2860_s24  }
 0xc49   : > { %p30_p9 = scmp.ge.s32.totalorder %s33_s29, 6  }
 0xc4b   :  { %32 = sbr.rel (!%p30_p9) target bundleno = 17 (0x11), region = 184 }

</bundles_post_ra>
